<compile_context>
chip_gen: v5e
topology: v5e:2x2
jax: 0.10.0
libtpu: 0.0.40
codegen_flags: <defaults>
</compile_context>

<pallas_src>
from typing import NamedTuple

import jax
import jax.numpy as jnp
from jax.experimental import pallas as pl
from jax.experimental.pallas import tpu as pltpu

LANE = 128


def _round_up(x, m):
    return ((x + m - 1) // m) * m


# ----------------------------------------------------------------------------
# One-time (import-time) hardware detection — not per forward call.
# ----------------------------------------------------------------------------
try:
    _DEV = jax.devices()[0]
    _IS_TPU = _DEV.platform == "tpu"
    _KIND = _DEV.device_kind.lower()
except Exception:  # pragma: no cover
    _IS_TPU, _KIND = False, ""

# bf16 operands on every TPU generation (v5e/v6e/v7x MXUs are bf16-native);
# f32 only as a conservative non-TPU fallback.
COMPUTE_DTYPE = jnp.bfloat16 if _IS_TPU else jnp.float32
# v7x has 2 TensorCores per chip; v5e/v6e have 1.
NUM_TENSORCORES = 2 if "v7" in _KIND else 1

# Flips to False if this JAX build rejects pipeline_mode=pl.Buffered(1).
_SINGLE_BUFFER_OK = True


# ----------------------------------------------------------------------------
# Kernel
# ----------------------------------------------------------------------------
def dqn_kernel(x_ref, w1_ref, b1_ref, w2_ref, b2_ref, w3_ref, b3_ref, o_ref):
    cdt = w1_ref.dtype
    # Cast the f32 state tile to the compute dtype here (hidden under matmuls).
    x = x_ref[...].astype(cdt)
    # fc1 + ReLU (f32 MXU accumulate, bias/activation in f32)
    h1 = jnp.dot(x, w1_ref[...], preferred_element_type=jnp.float32)
    h1 = jnp.maximum(h1 + b1_ref[...], 0.0)
    # fc2 + ReLU
    h2 = jnp.dot(h1.astype(cdt), w2_ref[...], preferred_element_type=jnp.float32)
    h2 = jnp.maximum(h2 + b2_ref[...], 0.0)
    # out (no activation); store in o_ref.dtype (bf16 on TPU → half the writeback)
    o = jnp.dot(h2.astype(cdt), w3_ref[...], preferred_element_type=jnp.float32)
    o_ref[...] = (o + b3_ref[...]).astype(o_ref.dtype)


# ----------------------------------------------------------------------------
# One-time parameter preparation (pad to 128-lane widths, cast to compute dtype)
# ----------------------------------------------------------------------------
class PreparedParams(NamedTuple):
    tensors: tuple       # (w1, b1, w2, b2, w3, b3) padded / cast, kernel-ready
    in_dim: int
    n_actions: int
    H1: int
    H2: int
    NP: int


def prepare_params(params, compute_dtype=None):
    """Pad weights/biases to lane-dense shapes and cast weights to the compute
    dtype. Call ONCE at init / after each parameter update — not per forward."""
    if compute_dtype is None:
        compute_dtype = COMPUTE_DTYPE
    w1, b1, w2, b2, w3, b3 = params
    in_dim = w1.shape[0]
    n_actions = w3.shape[1]
    H1 = _round_up(w1.shape[1], LANE)
    H2 = _round_up(w2.shape[1], LANE)
    NP = _round_up(n_actions, LANE)

    def pad2(a, rows, cols, dtype):
        return jnp.pad(a, ((0, rows - a.shape[0]), (0, cols - a.shape[1]))).astype(dtype)

    tensors = (
        pad2(w1, in_dim, H1, compute_dtype),
        pad2(b1, 1, H1, jnp.float32),
        pad2(w2, H1, H2, compute_dtype),
        pad2(b2, 1, H2, jnp.float32),
        pad2(w3, H2, NP, compute_dtype),
        pad2(b3, 1, NP, jnp.float32),
    )
    return PreparedParams(tensors, in_dim, n_actions, H1, H2, NP)


# ----------------------------------------------------------------------------
# Forward
# ----------------------------------------------------------------------------
def _choose_tm(B, block_m):
    """Batch tile: multiple of 16 (clean bf16 packing). Fat tiles on single-TC
    chips; on v7x make sure the grid has >=1 step per TensorCore."""
    Bp = _round_up(B, 16)
    if NUM_TENSORCORES >= 2 and Bp > 16:
        per_core = _round_up(pl.cdiv(Bp, NUM_TENSORCORES), 16)
        return max(16, min(block_m, per_core))
    return max(16, min(block_m, Bp))


def _build_call(tm, grid_m, in_dim, H1, H2, NP, out_dtype, single_buffer_weights):
    if single_buffer_weights:
        def wspec(shape):
            return pl.BlockSpec(shape, lambda i: (0,) * len(shape),
                                pipeline_mode=pl.Buffered(1))
    else:
        def wspec(shape):
            return pl.BlockSpec(shape, lambda i: (0,) * len(shape))

    return pl.pallas_call(
        dqn_kernel,
        out_shape=jax.ShapeDtypeStruct((grid_m * tm, NP), out_dtype),
        grid=(grid_m,),
        in_specs=[
            pl.BlockSpec((tm, in_dim), lambda i: (i, 0)),   # state: batch-tiled, f32
            wspec((in_dim, H1)), wspec((1, H1)),            # fc1 (VMEM-resident)
            wspec((H1, H2)), wspec((1, H2)),                # fc2 (VMEM-resident)
            wspec((H2, NP)), wspec((1, NP)),                # out (VMEM-resident)
        ],
        out_specs=pl.BlockSpec((tm, NP), lambda i: (i, 0)),
        compiler_params=pltpu.CompilerParams(
            dimension_semantics=("parallel",)),
    )


def dqn_forward(state, prepared: PreparedParams, *, block_m=512):
    """Fused MLP forward for the whole (mini)batch in one pallas_call.

    state    : (B, input_dims) f32
    prepared : PreparedParams from prepare_params(params)
    returns (B, n_actions) f32
    """
    global _SINGLE_BUFFER_OK
    B, in_dim = state.shape
    assert in_dim == prepared.in_dim, "state feature dim mismatch"

    tm = _choose_tm(B, block_m)
    Bp = _round_up(B, tm)
    grid_m = Bp // tm

    # Only the batch axis may need padding (state stays f32; cast is in-kernel).
    x_p = state if Bp == B else jnp.pad(state, ((0, Bp - B), (0, 0)))
    args = (x_p,) + tuple(prepared.tensors)
    out_dtype = prepared.tensors[0].dtype   # bf16 on TPU, f32 fallback

    out = None
    if _SINGLE_BUFFER_OK:
        try:
            out = _build_call(tm, grid_m, in_dim, prepared.H1, prepared.H2,
                              prepared.NP, out_dtype, True)(*args)
        except Exception:
            _SINGLE_BUFFER_OK = False   # this JAX build rejects Buffered(1)
    if out is None:
        out = _build_call(tm, grid_m, in_dim, prepared.H1, prepared.H2,
                          prepared.NP, out_dtype, False)(*args)

    # Strip batch padding + lane-padded action columns, upcast to f32 outside.
    return out[:B, :prepared.n_actions].astype(jnp.float32)


# ----------------------------------------------------------------------------
# Init + pure-JAX reference
# ----------------------------------------------------------------------------
def init_params(key, input_dims, fc1_dims, fc2_dims, n_actions):
    """Deterministic init mirroring nn.Linear default (uniform +/- 1/sqrt(fan_in)).
    Weights stored as (in, out), biases as (1, out)."""
    ks = jax.random.split(key, 6)

    def linear(kw, kb, fan_in, fan_out):
        bound = 1.0 / jnp.sqrt(fan_in)
        w = jax.random.uniform(kw, (fan_in, fan_out), jnp.float32, -bound, bound)
        b = jax.random.uniform(kb, (1, fan_out), jnp.float32, -bound, bound)
        return w, b

    w1, b1 = linear(ks[0], ks[1], input_dims, fc1_dims)
    w2, b2 = linear(ks[2], ks[3], fc1_dims, fc2_dims)
    w3, b3 = linear(ks[4], ks[5], fc2_dims, n_actions)
    return (w1, b1, w2, b2, w3, b3)


def dqn_reference(state, params, compute_dtype):
    """Pure-JAX reference using the same operand/output rounding as the kernel."""
    w1, b1, w2, b2, w3, b3 = params
    c = lambda a: a.astype(compute_dtype).astype(jnp.float32)
    h = jnp.maximum(c(state) @ c(w1) + b1, 0.0)
    h = jnp.maximum(c(h) @ c(w2) + b2, 0.0)
    o = c(h) @ c(w3) + b3
    return o.astype(compute_dtype).astype(jnp.float32)   # kernel stores bf16 on TPU


if __name__ == "__main__":
    # Small shapes consistent with the module's forward:
    # state (batch, input_dims), two hidden layers, n_actions outputs.
    batch, input_dims, fc1_dims, fc2_dims, n_actions = 256, 16, 32, 32, 4

    key = jax.random.PRNGKey(0)
    k_state, k_params = jax.random.split(key)
    state = jax.random.normal(k_state, (batch, input_dims), jnp.float32)
    params = init_params(k_params, input_dims, fc1_dims, fc2_dims, n_actions)

    # One-time parameter prep (hoisted out of the per-forward hot path).
    prepared = prepare_params(params)

    out = dqn_forward(state, prepared)
    jax.block_until_ready(out)

    ref = dqn_reference(state, params, COMPUTE_DTYPE)
    assert out.shape == (batch, n_actions)
    max_err = float(jnp.max(jnp.abs(out - ref)))
    assert jnp.allclose(out, ref, atol=2e-2, rtol=2e-2), max_err

    # Also exercise the batch-padding path with a non-aligned batch size.
    out_odd = dqn_forward(state[:37], prepared)
    jax.block_until_ready(out_odd)
    assert out_odd.shape == (37, n_actions)
    assert jnp.allclose(out_odd, ref[:37], atol=2e-2, rtol=2e-2)

    print("KERNEL_OK")
</pallas_src>

<mosaic_0001>
module attributes {stable_mosaic.version = 11 : i64} {
  func.func @dqn_kernel(%arg0: i32, %arg1: memref<256x16xf32, #tpu.memory_space<vmem>>, %arg2: memref<16x128xf32, #tpu.memory_space<vmem>>, %arg3: memref<1x128xf32, #tpu.memory_space<vmem>>, %arg4: memref<128x128xf32, #tpu.memory_space<vmem>>, %arg5: memref<1x128xf32, #tpu.memory_space<vmem>>, %arg6: memref<128x128xf32, #tpu.memory_space<vmem>>, %arg7: memref<1x128xf32, #tpu.memory_space<vmem>>, %arg8: memref<256x128xf32, #tpu.memory_space<vmem>>) attributes {dimension_semantics = [#tpu.dimension_semantics<parallel>], iteration_bounds = array<i64: 1>, scalar_prefetch = 0 : i64, scratch_operands = 0 : i64, tpu.core_type = #tpu.core_type<tc>, window_params = [{transform_indices = @transform_0, window_bounds = array<i64: 256, 16>}, {pipeline_mode = #tpu.pipeline_mode<synchronous>, transform_indices = @transform_1, window_bounds = array<i64: 16, 128>}, {pipeline_mode = #tpu.pipeline_mode<synchronous>, transform_indices = @transform_2, window_bounds = array<i64: 1, 128>}, {pipeline_mode = #tpu.pipeline_mode<synchronous>, transform_indices = @transform_3, window_bounds = array<i64: 128, 128>}, {pipeline_mode = #tpu.pipeline_mode<synchronous>, transform_indices = @transform_4, window_bounds = array<i64: 1, 128>}, {pipeline_mode = #tpu.pipeline_mode<synchronous>, transform_indices = @transform_5, window_bounds = array<i64: 128, 128>}, {pipeline_mode = #tpu.pipeline_mode<synchronous>, transform_indices = @transform_6, window_bounds = array<i64: 1, 128>}, {transform_indices = @transform_7, window_bounds = array<i64: 256, 128>}]} {
    %c0 = arith.constant 0 : index
    %c0_0 = arith.constant 0 : index
    %0 = vector.load %arg1[%c0, %c0_0] : memref<256x16xf32, #tpu.memory_space<vmem>>, vector<256x16xf32>
    %c0_1 = arith.constant 0 : index
    %c0_2 = arith.constant 0 : index
    %1 = vector.load %arg2[%c0_1, %c0_2] : memref<16x128xf32, #tpu.memory_space<vmem>>, vector<16x128xf32>
    %cst = arith.constant dense<0.000000e+00> : vector<256x128xf32>
    %2 = tpu.matmul %0, %1, %cst {dimension_numbers = #tpu.dot_dimension_numbers<[1], [0], [0], [1], [0, 0, 1, 1], [], []>} : vector<256x16xf32>, vector<16x128xf32>, vector<256x128xf32> -> vector<256x128xf32>
    %c0_3 = arith.constant 0 : index
    %c0_4 = arith.constant 0 : index
    %3 = vector.load %arg3[%c0_3, %c0_4] : memref<1x128xf32, #tpu.memory_space<vmem>>, vector<1x128xf32>
    %4 = vector.broadcast %3 : vector<1x128xf32> to vector<256x128xf32>
    %5 = arith.addf %2, %4 : vector<256x128xf32>
    %cst_5 = arith.constant 0.000000e+00 : f32
    %6 = vector.broadcast %cst_5 : f32 to vector<256x128xf32>
    %7 = arith.maximumf %5, %6 : vector<256x128xf32>
    %c0_6 = arith.constant 0 : index
    %c0_7 = arith.constant 0 : index
    %8 = vector.load %arg4[%c0_6, %c0_7] : memref<128x128xf32, #tpu.memory_space<vmem>>, vector<128x128xf32>
    %cst_8 = arith.constant dense<0.000000e+00> : vector<256x128xf32>
    %9 = tpu.matmul %7, %8, %cst_8 {dimension_numbers = #tpu.dot_dimension_numbers<[1], [0], [0], [1], [0, 0, 1, 1], [], []>} : vector<256x128xf32>, vector<128x128xf32>, vector<256x128xf32> -> vector<256x128xf32>
    %c0_9 = arith.constant 0 : index
    %c0_10 = arith.constant 0 : index
    %10 = vector.load %arg5[%c0_9, %c0_10] : memref<1x128xf32, #tpu.memory_space<vmem>>, vector<1x128xf32>
    %11 = vector.broadcast %10 : vector<1x128xf32> to vector<256x128xf32>
    %12 = arith.addf %9, %11 : vector<256x128xf32>
    %cst_11 = arith.constant 0.000000e+00 : f32
    %13 = vector.broadcast %cst_11 : f32 to vector<256x128xf32>
    %14 = arith.maximumf %12, %13 : vector<256x128xf32>
    %c0_12 = arith.constant 0 : index
    %c0_13 = arith.constant 0 : index
    %15 = vector.load %arg6[%c0_12, %c0_13] : memref<128x128xf32, #tpu.memory_space<vmem>>, vector<128x128xf32>
    %cst_14 = arith.constant dense<0.000000e+00> : vector<256x128xf32>
    %16 = tpu.matmul %14, %15, %cst_14 {dimension_numbers = #tpu.dot_dimension_numbers<[1], [0], [0], [1], [0, 0, 1, 1], [], []>} : vector<256x128xf32>, vector<128x128xf32>, vector<256x128xf32> -> vector<256x128xf32>
    %c0_15 = arith.constant 0 : index
    %c0_16 = arith.constant 0 : index
    %17 = vector.load %arg7[%c0_15, %c0_16] : memref<1x128xf32, #tpu.memory_space<vmem>>, vector<1x128xf32>
    %18 = vector.broadcast %17 : vector<1x128xf32> to vector<256x128xf32>
    %19 = arith.addf %16, %18 : vector<256x128xf32>
    %c0_17 = arith.constant 0 : index
    %c0_18 = arith.constant 0 : index
    %20 = vector.load %arg8[%c0_17, %c0_18] : memref<256x128xf32, #tpu.memory_space<vmem>>, vector<256x128xf32>
    tpu.vector_store %arg8[%c0_17, %c0_18], %19 {strides = array<i32>} : memref<256x128xf32, #tpu.memory_space<vmem>>, vector<256x128xf32>,
    return
  }
  func.func @transform_0(%arg0: i32) -> (i32, i32) {
    %c0_i32 = arith.constant 0 : i32
    %c0_i32_0 = arith.constant 0 : i32
    return %arg0, %c0_i32 : i32, i32
  }
  func.func @transform_1(%arg0: i32) -> (i32, i32) {
    %c0_i32 = arith.constant 0 : i32
    %c0_i32_0 = arith.constant 0 : i32
    %c0_i32_1 = arith.constant 0 : i32
    return %c0_i32, %c0_i32_0 : i32, i32
  }
  func.func @transform_2(%arg0: i32) -> (i32, i32) {
    %c0_i32 = arith.constant 0 : i32
    %c0_i32_0 = arith.constant 0 : i32
    %c0_i32_1 = arith.constant 0 : i32
    return %c0_i32, %c0_i32_0 : i32, i32
  }
  func.func @transform_3(%arg0: i32) -> (i32, i32) {
    %c0_i32 = arith.constant 0 : i32
    %c0_i32_0 = arith.constant 0 : i32
    %c0_i32_1 = arith.constant 0 : i32
    return %c0_i32, %c0_i32_0 : i32, i32
  }
  func.func @transform_4(%arg0: i32) -> (i32, i32) {
    %c0_i32 = arith.constant 0 : i32
    %c0_i32_0 = arith.constant 0 : i32
    %c0_i32_1 = arith.constant 0 : i32
    return %c0_i32, %c0_i32_0 : i32, i32
  }
  func.func @transform_5(%arg0: i32) -> (i32, i32) {
    %c0_i32 = arith.constant 0 : i32
    %c0_i32_0 = arith.constant 0 : i32
    %c0_i32_1 = arith.constant 0 : i32
    return %c0_i32, %c0_i32_0 : i32, i32
  }
  func.func @transform_6(%arg0: i32) -> (i32, i32) {
    %c0_i32 = arith.constant 0 : i32
    %c0_i32_0 = arith.constant 0 : i32
    %c0_i32_1 = arith.constant 0 : i32
    return %c0_i32, %c0_i32_0 : i32, i32
  }
  func.func @transform_7(%arg0: i32) -> (i32, i32) {
    %c0_i32 = arith.constant 0 : i32
    %c0_i32_0 = arith.constant 0 : i32
    return %arg0, %c0_i32 : i32, i32
  }
}

module attributes {stable_mosaic.version = 11 : i64} {
  func.func @dqn_kernel(%arg0: i32, %arg1: memref<256x16xf32, #tpu.memory_space<vmem>>, %arg2: memref<16x128xf32, #tpu.memory_space<vmem>>, %arg3: memref<1x128xf32, #tpu.memory_space<vmem>>, %arg4: memref<128x128xf32, #tpu.memory_space<vmem>>, %arg5: memref<1x128xf32, #tpu.memory_space<vmem>>, %arg6: memref<128x128xf32, #tpu.memory_space<vmem>>, %arg7: memref<1x128xf32, #tpu.memory_space<vmem>>, %arg8: memref<256x128xf32, #tpu.memory_space<vmem>>) attributes {dimension_semantics = [#tpu.dimension_semantics<parallel>], iteration_bounds = array<i64: 1>, scalar_prefetch = 0 : i64, scratch_operands = 0 : i64, tpu.core_type = #tpu.core_type<tc>, window_params = [{transform_indices = @transform_0, window_bounds = array<i64: 256, 16>}, {pipeline_mode = #tpu.pipeline_mode<synchronous>, transform_indices = @transform_1, window_bounds = array<i64: 16, 128>}, {pipeline_mode = #tpu.pipeline_mode<synchronous>, transform_indices = @transform_2, window_bounds = array<i64: 1, 128>}, {pipeline_mode = #tpu.pipeline_mode<synchronous>, transform_indices = @transform_3, window_bounds = array<i64: 128, 128>}, {pipeline_mode = #tpu.pipeline_mode<synchronous>, transform_indices = @transform_4, window_bounds = array<i64: 1, 128>}, {pipeline_mode = #tpu.pipeline_mode<synchronous>, transform_indices = @transform_5, window_bounds = array<i64: 128, 128>}, {pipeline_mode = #tpu.pipeline_mode<synchronous>, transform_indices = @transform_6, window_bounds = array<i64: 1, 128>}, {transform_indices = @transform_7, window_bounds = array<i64: 256, 128>}]} {
    %c0 = arith.constant 0 : index
    %c0_0 = arith.constant 0 : index
    %0 = vector.load %arg1[%c0, %c0_0] : memref<256x16xf32, #tpu.memory_space<vmem>>, vector<256x16xf32>
    %c0_1 = arith.constant 0 : index
    %c0_2 = arith.constant 0 : index
    %1 = vector.load %arg2[%c0_1, %c0_2] : memref<16x128xf32, #tpu.memory_space<vmem>>, vector<16x128xf32>
    %cst = arith.constant dense<0.000000e+00> : vector<256x128xf32>
    %2 = tpu.matmul %0, %1, %cst {dimension_numbers = #tpu.dot_dimension_numbers<[1], [0], [0], [1], [0, 0, 1, 1], [], []>} : vector<256x16xf32>, vector<16x128xf32>, vector<256x128xf32> -> vector<256x128xf32>
    %c0_3 = arith.constant 0 : index
    %c0_4 = arith.constant 0 : index
    %3 = vector.load %arg3[%c0_3, %c0_4] : memref<1x128xf32, #tpu.memory_space<vmem>>, vector<1x128xf32>
    %4 = vector.broadcast %3 : vector<1x128xf32> to vector<256x128xf32>
    %5 = arith.addf %2, %4 : vector<256x128xf32>
    %cst_5 = arith.constant 0.000000e+00 : f32
    %6 = vector.broadcast %cst_5 : f32 to vector<256x128xf32>
    %7 = arith.maximumf %5, %6 : vector<256x128xf32>
    %c0_6 = arith.constant 0 : index
    %c0_7 = arith.constant 0 : index
    %8 = vector.load %arg4[%c0_6, %c0_7] : memref<128x128xf32, #tpu.memory_space<vmem>>, vector<128x128xf32>
    %cst_8 = arith.constant dense<0.000000e+00> : vector<256x128xf32>
    %9 = tpu.matmul %7, %8, %cst_8 {dimension_numbers = #tpu.dot_dimension_numbers<[1], [0], [0], [1], [0, 0, 1, 1], [], []>} : vector<256x128xf32>, vector<128x128xf32>, vector<256x128xf32> -> vector<256x128xf32>
    %c0_9 = arith.constant 0 : index
    %c0_10 = arith.constant 0 : index
    %10 = vector.load %arg5[%c0_9, %c0_10] : memref<1x128xf32, #tpu.memory_space<vmem>>, vector<1x128xf32>
    %11 = vector.broadcast %10 : vector<1x128xf32> to vector<256x128xf32>
    %12 = arith.addf %9, %11 : vector<256x128xf32>
    %cst_11 = arith.constant 0.000000e+00 : f32
    %13 = vector.broadcast %cst_11 : f32 to vector<256x128xf32>
    %14 = arith.maximumf %12, %13 : vector<256x128xf32>
    %c0_12 = arith.constant 0 : index
    %c0_13 = arith.constant 0 : index
    %15 = vector.load %arg6[%c0_12, %c0_13] : memref<128x128xf32, #tpu.memory_space<vmem>>, vector<128x128xf32>
    %cst_14 = arith.constant dense<0.000000e+00> : vector<256x128xf32>
    %16 = tpu.matmul %14, %15, %cst_14 {dimension_numbers = #tpu.dot_dimension_numbers<[1], [0], [0], [1], [0, 0, 1, 1], [], []>} : vector<256x128xf32>, vector<128x128xf32>, vector<256x128xf32> -> vector<256x128xf32>
    %c0_15 = arith.constant 0 : index
    %c0_16 = arith.constant 0 : index
    %17 = vector.load %arg7[%c0_15, %c0_16] : memref<1x128xf32, #tpu.memory_space<vmem>>, vector<1x128xf32>
    %18 = vector.broadcast %17 : vector<1x128xf32> to vector<256x128xf32>
    %19 = arith.addf %16, %18 : vector<256x128xf32>
    %c0_17 = arith.constant 0 : index
    %c0_18 = arith.constant 0 : index
    %20 = vector.load %arg8[%c0_17, %c0_18] : memref<256x128xf32, #tpu.memory_space<vmem>>, vector<256x128xf32>
    tpu.vector_store %arg8[%c0_17, %c0_18], %19 {strides = array<i32>} : memref<256x128xf32, #tpu.memory_space<vmem>>, vector<256x128xf32>,
    return
  }
  func.func @transform_0(%arg0: i32) -> (i32, i32) {
    %c0_i32 = arith.constant 0 : i32
    %c0_i32_0 = arith.constant 0 : i32
    return %arg0, %c0_i32 : i32, i32
  }
  func.func @transform_1(%arg0: i32) -> (i32, i32) {
    %c0_i32 = arith.constant 0 : i32
    %c0_i32_0 = arith.constant 0 : i32
    %c0_i32_1 = arith.constant 0 : i32
    return %c0_i32, %c0_i32_0 : i32, i32
  }
  func.func @transform_2(%arg0: i32) -> (i32, i32) {
    %c0_i32 = arith.constant 0 : i32
    %c0_i32_0 = arith.constant 0 : i32
    %c0_i32_1 = arith.constant 0 : i32
    return %c0_i32, %c0_i32_0 : i32, i32
  }
  func.func @transform_3(%arg0: i32) -> (i32, i32) {
    %c0_i32 = arith.constant 0 : i32
    %c0_i32_0 = arith.constant 0 : i32
    %c0_i32_1 = arith.constant 0 : i32
    return %c0_i32, %c0_i32_0 : i32, i32
  }
  func.func @transform_4(%arg0: i32) -> (i32, i32) {
    %c0_i32 = arith.constant 0 : i32
    %c0_i32_0 = arith.constant 0 : i32
    %c0_i32_1 = arith.constant 0 : i32
    return %c0_i32, %c0_i32_0 : i32, i32
  }
  func.func @transform_5(%arg0: i32) -> (i32, i32) {
    %c0_i32 = arith.constant 0 : i32
    %c0_i32_0 = arith.constant 0 : i32
    %c0_i32_1 = arith.constant 0 : i32
    return %c0_i32, %c0_i32_0 : i32, i32
  }
  func.func @transform_6(%arg0: i32) -> (i32, i32) {
    %c0_i32 = arith.constant 0 : i32
    %c0_i32_0 = arith.constant 0 : i32
    %c0_i32_1 = arith.constant 0 : i32
    return %c0_i32, %c0_i32_0 : i32, i32
  }
  func.func @transform_7(%arg0: i32) -> (i32, i32) {
    %c0_i32 = arith.constant 0 : i32
    %c0_i32_0 = arith.constant 0 : i32
    return %arg0, %c0_i32 : i32, i32
  }
}

</mosaic_0001>

<bundles_post_ra>
// kernel: tpu_custom_call.1
= control target key start
LH: loop header
LB: loop body
LE: loop exit
PB: predicated region body
PF: predicated region fallthrough
CT: control target
= control target key end

     0   :  { %vm65_vm0 = vcmask 130048   ;;  %s1140_s0 = inlined_call_operand.vmem [shape: f32[256,16], index: 0, kind: input, shape index: {}]   ;;  %s1141_s1 = inlined_call_operand.vmem [shape: f32[16,128], index: 1, kind: input, shape index: {}]   ;;  %s1142_s2 = inlined_call_operand.vmem [shape: f32[1,128], index: 2, kind: input, shape index: {}]   ;;  %s1143_s3 = inlined_call_operand.vmem [shape: f32[128,128], index: 3, kind: input, shape index: {}]   ;;  %s1144_s4 = inlined_call_operand.vmem [shape: f32[1,128], index: 4, kind: input, shape index: {}]   ;;  %s1145_s5 = inlined_call_operand.vmem [shape: f32[128,128], index: 5, kind: input, shape index: {}]   ;;  %s1146_s6 = inlined_call_operand.vmem [shape: f32[1,128], index: 6, kind: input, shape index: {}]   ;;  %s1147_s7 = inlined_call_operand.hbm [shape: f32[256,128], index: 7, kind: output, shape index: {}]  }
   0x1   :  { %v60_v0 = vld [vmem:[%s1141_s1 + $0x8] sm:$0xff]  ;;  %v59_v1 = vld [vmem:[%s1141_s1] sm:$0xff] }
   0x2   :  { %176 = vmatpush.msra.mxu0 %v60_v0  ;;  %v27_v2 = vld [vmem:[%s1140_s0] sm:$0xff]  ;;  %687 = vmatpush.msra.mxu3 %v60_v0 }
   0x4   :  { %177 = vmatpush.msra.mxu0 %v59_v1  ;;  %688 = vmatpush.msra.mxu3 %v59_v1 }
   0x5   :  { %12 = vsyncpa [#allocation3], 0  ;;  %655 = vmatmul.msk.f32.vlgmr.msra.gmra.mxu0 %vm65_vm0, %v27_v2  ;;  %v28_v3 = vld [vmem:[%s1140_s0 + $0x8] sm:$0xff]  ;;  %v29_v4 = vld [vmem:[%s1140_s0 + $0x10] sm:$0xff]  ;;  %s643_s12 = sshll.u32 %s1147_s7, 4  ;;  %s754_s13 = smov 128   ;;  %s644_s12 = int_to_ptr.hbm [resolvable:$true] %s643_s12 }
   0x6   :  { %v30_v5 = vld [vmem:[%s1140_s0 + $0x18] sm:$0xff]  ;;  %v31_v6 = vld [vmem:[%s1140_s0 + $0x20] sm:$0xff]  ;;  %v32_v7 = vld [vmem:[%s1140_s0 + $0x28] sm:$0xff]  ;;  %s755_s14 = smov 8  }
   0x7   :  { %v33_v8 = vld [vmem:[%s1140_s0 + $0x30] sm:$0xff]  ;;  %v34_v9 = vld [vmem:[%s1140_s0 + $0x38] sm:$0xff]  ;;  %v35_v10 = vld [vmem:[%s1140_s0 + $0x40] sm:$0xff] }
   0x8   :  { %v322_v11 = vld [vmem:[%s1143_s3 + $0x78] sm:$0xff]  ;;  %v321_v12 = vld [vmem:[%s1143_s3 + $0x70] sm:$0xff]  ;;  %v320_v13 = vld [vmem:[%s1143_s3 + $0x68] sm:$0xff] }
   0x9   :  { %327 = vmatpush.msra.mxu1 %v322_v11  ;;  %689 = vmatpush.msrb.mxu3 %v322_v11  ;;  %v36_v14 = vld [vmem:[%s1140_s0 + $0x48] sm:$0xff]  ;;  %v319_v15 = vld [vmem:[%s1143_s3 + $0x60] sm:$0xff]  ;;  %v318_v16 = vld [vmem:[%s1143_s3 + $0x58] sm:$0xff] }
   0xa   :  { %v317_v17 = vld [vmem:[%s1143_s3 + $0x50] sm:$0xff]  ;;  %v316_v18 = vld [vmem:[%s1143_s3 + $0x48] sm:$0xff]  ;;  %v315_v20 = vld [vmem:[%s1143_s3 + $0x40] sm:$0xff] }
   0xb   :  { %328 = vmatpush.msra.mxu1 %v321_v12  ;;  %690 = vmatpush.msrb.mxu3 %v321_v12  ;;  %v37_v19 = vld [vmem:[%s1140_s0 + $0x50] sm:$0xff]  ;;  %v314_v21 = vld [vmem:[%s1143_s3 + $0x38] sm:$0xff]  ;;  %v312_v23 = vld [vmem:[%s1143_s3 + $0x28] sm:$0xff] }
   0xc   :  { %v313_v22 = vld [vmem:[%s1143_s3 + $0x30] sm:$0xff]  ;;  %v38_v24 = vld [vmem:[%s1140_s0 + $0x58] sm:$0xff]  ;;  %v311_v25 = vld [vmem:[%s1143_s3 + $0x20] sm:$0xff] }
   0xd   :  { %656 = vmatmul.msk.f32.gmra.mxu0 %vm65_vm0, %v28_v3  ;;  %329 = vmatpush.msra.mxu1 %v320_v13  ;;  %v310_v26 = vld [vmem:[%s1143_s3 + $0x18] sm:$0xff]  ;;  %v309_v27 = vld [vmem:[%s1143_s3 + $0x10] sm:$0xff]  ;;  %v39_v28 = vld [vmem:[%s1140_s0 + $0x60] sm:$0xff] }
   0xe   :  { %691 = vmatpush.msrb.mxu3 %v320_v13  ;;  %v308_v29 = vld [vmem:[%s1143_s3 + $0x8] sm:$0xff]  ;;  %v307_v30 = vld [vmem:[%s1143_s3] sm:$0xff]  ;;  %v41_v32 = vld [vmem:[%s1140_s0 + $0x70] sm:$0xff] }
   0xf   :  { %330 = vmatpush.msra.mxu1 %v319_v15  ;;  %v40_v31 = vld [vmem:[%s1140_s0 + $0x68] sm:$0xff]  ;;  %v42_v33 = vld [vmem:[%s1140_s0 + $0x78] sm:$0xff]  ;;  %v917_v34 = vld [vmem:[%s1142_s2] ss:$0 sm:$0xff] }
  0x10   :  { %692 = vmatpush.msrb.mxu3 %v319_v15  ;;  %v43_v36 = vld [vmem:[%s1140_s0 + $0x80] sm:$0xff]  ;;  %v44_v40 = vld [vmem:[%s1140_s0 + $0x88] sm:$0xff]  ;;  %v45_v44 = vld [vmem:[%s1140_s0 + $0x90] sm:$0xff] }
  0x11   :  { %331 = vmatpush.msra.mxu1 %v318_v16  ;;  %v46_v48 = vld [vmem:[%s1140_s0 + $0x98] sm:$0xff]  ;;  %v47_v52 = vld [vmem:[%s1140_s0 + $0xa0] sm:$0xff]  ;;  %v48_v56 = vld [vmem:[%s1140_s0 + $0xa8] sm:$0xff] }
  0x12   :  { %693 = vmatpush.msrb.mxu3 %v318_v16  ;;  %v53_v59 = vld [vmem:[%s1140_s0 + $0xd0] sm:$0xff]  ;;  %v54_v0 = vld [vmem:[%s1140_s0 + $0xd8] sm:$0xff]  ;;  %v52_v13 = vld [vmem:[%s1140_s0 + $0xc8] sm:$0xff] }
  0x13   :  { %332 = vmatpush.msra.mxu1 %v317_v17  ;;  %681 = vmatmul.msk.f32.vlgmr.msra.gmra.mxu3 %vm65_vm0, %v53_v59  ;;  %v49_v61 = vld [vmem:[%s1140_s0 + $0xb0] sm:$0xff]  ;;  %v50_v2 = vld [vmem:[%s1140_s0 + $0xb8] sm:$0xff] }
  0x14   :  { %694 = vmatpush.msrb.mxu3 %v317_v17  ;;  %v487_v11 = vld [vmem:[%s1145_s5 + $0x78] sm:$0xff]  ;;  %v486_v15 = vld [vmem:[%s1145_s5 + $0x70] sm:$0xff]  ;;  %v485_v17 = vld [vmem:[%s1145_s5 + $0x68] sm:$0xff] }
  0x15   :  { %657 = vmatmul.msk.f32.gmra.mxu0 %vm65_vm0, %v29_v4  ;;  %333 = vmatpush.msra.mxu1 %v316_v18 }
  0x16   :  { %695 = vmatpush.msrb.mxu3 %v316_v18  ;;  %492 = vmatpush.msra.mxu2 %v487_v11  ;;  %v57_v18 = vld [vmem:[%s1140_s0 + $0xf0] sm:$0xff] }
  0x17   :  { %334 = vmatpush.msra.mxu1 %v315_v20 }
  0x18   :  { %696 = vmatpush.msrb.mxu3 %v315_v20  ;;  %493 = vmatpush.msra.mxu2 %v486_v15  ;;  %v483_v20 = vld [vmem:[%s1145_s5 + $0x58] sm:$0xff] }
  0x19   :  { %335 = vmatpush.msra.mxu1 %v314_v21 }
  0x1a   :  { %697 = vmatpush.msrb.mxu3 %v314_v21  ;;  %494 = vmatpush.msra.mxu2 %v485_v17 }
  0x1b   :  { %336 = vmatpush.msra.mxu1 %v313_v22  ;;  %682 = vmatmul.msk.f32.gmra.mxu3 %vm65_vm0, %v54_v0 }
  0x1c   :  { %698 = vmatpush.msrb.mxu3 %v313_v22 }
  0x1d   :  { %658 = vmatmul.msk.f32.gmra.mxu0 %vm65_vm0, %v30_v5  ;;  %337 = vmatpush.msra.mxu1 %v312_v23  ;;  %v55_v5 = vld [vmem:[%s1140_s0 + $0xe0] sm:$0xff] }
  0x1e   :  { %699 = vmatpush.msrb.mxu3 %v312_v23  ;;  %v482_v23 = vld [vmem:[%s1145_s5 + $0x50] sm:$0xff] }
  0x1f   :  { %338 = vmatpush.msra.mxu1 %v311_v25 }
  0x20   :  { %700 = vmatpush.msrb.mxu3 %v311_v25  ;;  %v481_v25 = vld [vmem:[%s1145_s5 + $0x48] sm:$0xff] }
  0x21   :  { %339 = vmatpush.msra.mxu1 %v310_v26 }
  0x22   :  { %701 = vmatpush.msrb.mxu3 %v310_v26  ;;  %v58_v26 = vld [vmem:[%s1140_s0 + $0xf8] sm:$0xff] }
  0x23   :  { %340 = vmatpush.msra.mxu1 %v309_v27  ;;  %683 = vmatmul.msk.f32.gmra.mxu3 %vm65_vm0, %v55_v5 }
  0x24   :  { %702 = vmatpush.msrb.mxu3 %v309_v27  ;;  %v480_v27 = vld [vmem:[%s1145_s5 + $0x40] sm:$0xff] }
  0x25   :  { %659 = vmatmul.msk.f32.gmra.mxu0 %vm65_vm0, %v31_v6  ;;  %341 = vmatpush.msra.mxu1 %v308_v29 }
  0x26   :  { %703 = vmatpush.msrb.mxu3 %v308_v29 }
  0x27   :  { %342 = vmatpush.msra.mxu1 %v307_v30 }
  0x28   :  { %704 = vmatpush.msrb.mxu3 %v307_v30 }
  0x2a   :  { %705 = vmatpush.msra.mxu3 %v487_v11 }
  0x2c   :  { %706 = vmatpush.msra.mxu3 %v486_v15 }
  0x2d   :  { %660 = vmatmul.msk.f32.gmra.mxu0 %vm65_vm0, %v32_v7  ;;  %v51_v7 = vld [vmem:[%s1140_s0 + $0xc0] sm:$0xff] }
  0x2e   :  { %707 = vmatpush.msra.mxu3 %v485_v17 }
  0x35   :  { %661 = vmatmul.msk.f32.gmra.mxu0 %vm65_vm0, %v33_v8 }
  0x3d   :  { %662 = vmatmul.msk.f32.gmra.mxu0 %vm65_vm0, %v34_v9 }
  0x45   :  { %663 = vmatmul.msk.f32.gmra.mxu0 %vm65_vm0, %v35_v10  ;;  %v56_v10 = vld [vmem:[%s1140_s0 + $0xe8] sm:$0xff] }
  0x46   :  { %684 = vmatmul.msk.f32.gmra.mxu3 %vm65_vm0, %v56_v10 }
  0x4d   :  { %664 = vmatmul.msk.f32.gmra.mxu0 %vm65_vm0, %v36_v14 }
  0x4e   :  { %685 = vmatmul.msk.f32.gmra.mxu3 %vm65_vm0, %v57_v18 }
  0x55   :  { %665 = vmatmul.msk.f32.gmra.mxu0 %vm65_vm0, %v37_v19  ;;  %v484_v19 = vld [vmem:[%s1145_s5 + $0x60] sm:$0xff] }
  0x56   :  { %495 = vmatpush.msra.mxu2 %v484_v19  ;;  %708 = vmatpush.msra.mxu3 %v484_v19 }
  0x57   :  { %686 = vmatmul.msk.f32.gmra.mxu3 %vm65_vm0, %v58_v26 }
  0x58   :  { %496 = vmatpush.msra.mxu2 %v483_v20  ;;  %709 = vmatpush.msra.mxu3 %v483_v20 }
  0x5a   :  { %497 = vmatpush.msra.mxu2 %v482_v23  ;;  %710 = vmatpush.msra.mxu3 %v482_v23 }
  0x5c   :  { %498 = vmatpush.msra.mxu2 %v481_v25  ;;  %711 = vmatpush.msra.mxu3 %v481_v25 }
  0x5d   :  { %666 = vmatmul.msk.f32.gmra.mxu0 %vm65_vm0, %v38_v24 }
  0x5e   :  { %499 = vmatpush.msra.mxu2 %v480_v27  ;;  %712 = vmatpush.msra.mxu3 %v480_v27 }
  0x65   :  { %667 = vmatmul.msk.f32.gmra.mxu0 %vm65_vm0, %v39_v28  ;;  %v479_v28 = vld [vmem:[%s1145_s5 + $0x38] sm:$0xff] }
  0x66   :  { %500 = vmatpush.msra.mxu2 %v479_v28  ;;  %713 = vmatpush.msra.mxu3 %v479_v28 }
  0x6d   :  { %668 = vmatmul.msk.f32.gmra.mxu0 %vm65_vm0, %v40_v31  ;;  %v478_v31 = vld [vmem:[%s1145_s5 + $0x30] sm:$0xff] }
  0x6e   :  { %501 = vmatpush.msra.mxu2 %v478_v31  ;;  %714 = vmatpush.msra.mxu3 %v478_v31 }
  0x75   :  { %669 = vmatmul.msk.f32.gmra.mxu0 %vm65_vm0, %v41_v32 }
  0x7d   :  { %670 = vmatmul.msk.f32.gmra.mxu0 %vm65_vm0, %v42_v33  ;;  %v477_v33 = vld [vmem:[%s1145_s5 + $0x28] sm:$0xff] }
  0x7e   :  { %502 = vmatpush.msra.mxu2 %v477_v33  ;;  %715 = vmatpush.msra.mxu3 %v477_v33 }
  0x82   :  { %v179_v35 = vpop.f32.mrf.mxu0 }
  0x83   :  { %v180_v37 = vadd.f32 %v917_v34, %v179_v35  ;;  %v476_v35 = vld [vmem:[%s1145_s5 + $0x20] sm:$0xff] }
  0x84   :  { %503 = vmatpush.msra.mxu2 %v476_v35  ;;  %716 = vmatpush.msra.mxu3 %v476_v35 }
  0x85   :  { %671 = vmatmul.msk.f32.gmra.mxu0 %vm65_vm0, %v43_v36  ;;  %v275_v38 = vmax.f32 %v180_v37, 0.0  ;;  %v475_v36 = vld [vmem:[%s1145_s5 + $0x18] sm:$0xff] }
  0x86   :  { %504 = vmatpush.msra.mxu2 %v475_v36  ;;  %717 = vmatpush.msra.mxu3 %v475_v36 }
  0x87   :  { %343 = vmatmul.f32.vlgmr.msra.gmra.mxu1 %v275_v38 }
  0x8a   :  { %v182_v39 = vpop.f32.mrf.mxu0 }
  0x8b   :  { %v183_v41 = vadd.f32 %v917_v34, %v182_v39  ;;  %v474_v39 = vld [vmem:[%s1145_s5 + $0x10] sm:$0xff] }
  0x8c   :  { %505 = vmatpush.msra.mxu2 %v474_v39  ;;  %718 = vmatpush.msra.mxu3 %v474_v39 }
  0x8d   :  { %672 = vmatmul.msk.f32.gmra.mxu0 %vm65_vm0, %v44_v40  ;;  %v276_v42 = vmax.f32 %v183_v41, 0.0  ;;  %v473_v41 = vld [vmem:[%s1145_s5 + $0x8] sm:$0xff] }
  0x8e   :  { %506 = vmatpush.msra.mxu2 %v473_v41  ;;  %719 = vmatpush.msra.mxu3 %v473_v41 }
  0x8f   :  { %346 = vmatmul.f32.gmra.mxu1 %v276_v42  ;;  %v472_v42 = vld [vmem:[%s1145_s5] sm:$0xff] }
  0x90   :  { %507 = vmatpush.msra.mxu2 %v472_v42  ;;  %720 = vmatpush.msra.mxu3 %v472_v42 }
  0x92   :  { %v185_v43 = vpop.f32.mrf.mxu0 }
  0x93   :  { %v186_v45 = vadd.f32 %v917_v34, %v185_v43 }
  0x95   :  { %v277_v46 = vmax.f32 %v186_v45, 0.0  ;;  %673 = vmatmul.msk.f32.gmra.mxu0 %vm65_vm0, %v45_v44 }
  0x96   :  { %v257_v39 = vpop.f32.mrf.mxu3 }
  0x97   :  { %349 = vmatmul.f32.gmra.mxu1 %v277_v46 }
  0x9a   :  { %v188_v47 = vpop.f32.mrf.mxu0 }
  0x9b   :  { %v189_v49 = vadd.f32 %v917_v34, %v188_v47 }
  0x9d   :  { %v278_v50 = vmax.f32 %v189_v49, 0.0  ;;  %674 = vmatmul.msk.f32.gmra.mxu0 %vm65_vm0, %v46_v48 }
  0x9f   :  { %352 = vmatmul.f32.gmra.mxu1 %v278_v50 }
  0xa2   :  { %v191_v51 = vpop.f32.mrf.mxu0 }
  0xa3   :  { %v192_v53 = vadd.f32 %v917_v34, %v191_v51 }
  0xa5   :  { %v279_v54 = vmax.f32 %v192_v53, 0.0  ;;  %675 = vmatmul.msk.f32.gmra.mxu0 %vm65_vm0, %v47_v52  ;;  %v1050_v52 = vld [vmem:[%s1144_s4] ss:$0 sm:$0xff] }
  0xa7   :  { %355 = vmatmul.f32.gmra.mxu1 %v279_v54 }
  0xaa   :  { %v194_v55 = vpop.f32.mrf.mxu0 }
  0xab   :  { %v195_v57 = vadd.f32 %v917_v34, %v194_v55 }
  0xad   :  { %v280_v58 = vmax.f32 %v195_v57, 0.0  ;;  %676 = vmatmul.msk.f32.gmra.mxu0 %vm65_vm0, %v48_v56 }
  0xaf   :  { %358 = vmatmul.f32.gmra.mxu1 %v280_v58 }
  0xb2   :  { %v197_v60 = vpop.f32.mrf.mxu0 }
  0xb3   :  { %v198_v62 = vadd.f32 %v917_v34, %v197_v60 }
  0xb5   :  { %v281_v63 = vmax.f32 %v198_v62, 0.0  ;;  %677 = vmatmul.msk.f32.gmra.mxu0 %vm65_vm0, %v49_v61 }
  0xb7   :  { %361 = vmatmul.f32.gmra.mxu1 %v281_v63 }
  0xba   :  { %v200_v1 = vpop.f32.mrf.mxu0 }
  0xbb   :  { %v201_v3 = vadd.f32 %v917_v34, %v200_v1 }
  0xbd   :  { %v282_v4 = vmax.f32 %v201_v3, 0.0  ;;  %678 = vmatmul.msk.f32.gmra.mxu0 %vm65_vm0, %v50_v2 }
  0xbf   :  { %364 = vmatmul.f32.gmra.mxu1 %v282_v4 }
  0xc2   :  { %v203_v6 = vpop.f32.mrf.mxu0 }
  0xc3   :  { %v204_v8 = vadd.f32 %v917_v34, %v203_v6 }
  0xc5   :  { %v283_v9 = vmax.f32 %v204_v8, 0.0  ;;  %679 = vmatmul.msk.f32.gmra.mxu0 %vm65_vm0, %v51_v7 }
  0xc7   :  { %367 = vmatmul.f32.gmra.mxu1 %v283_v9 }
  0xca   :  { %v206_v12 = vpop.f32.mrf.mxu0 }
  0xcb   :  { %v207_v14 = vadd.f32 %v917_v34, %v206_v12 }
  0xcd   :  { %v284_v16 = vmax.f32 %v207_v14, 0.0  ;;  %680 = vmatmul.msk.f32.gmra.mxu0 %vm65_vm0, %v52_v13 }
  0xcf   :  { %370 = vmatmul.f32.gmra.mxu1 %v284_v16 }
  0xd2   :  { %v209_v21 = vpop.f32.mrf.mxu0 }
  0xd3   :  { %v210_v22 = vadd.f32 %v917_v34, %v209_v21 }
  0xd5   :  { %v285_v24 = vmax.f32 %v210_v22, 0.0 }
  0xd7   :  { %373 = vmatmul.f32.gmra.mxu1 %v285_v24 }
  0xda   :  { %v212_v29 = vpop.f32.mrf.mxu0 }
  0xdb   :  { %v213_v30 = vadd.f32 %v917_v34, %v212_v29 }
  0xdd   :  { %v286_v32 = vmax.f32 %v213_v30, 0.0 }
  0xdf   :  { %376 = vmatmul.f32.gmra.mxu1 %v286_v32 }
  0xe2   :  { %v215_v37 = vpop.f32.mrf.mxu0 }
  0xe3   :  { %v216_v38 = vadd.f32 %v917_v34, %v215_v37 }
  0xe5   :  { %v287_v40 = vmax.f32 %v216_v38, 0.0 }
  0xe7   :  { %379 = vmatmul.f32.gmra.mxu1 %v287_v40 }
  0xea   :  { %v218_v43 = vpop.f32.mrf.mxu0 }
  0xeb   :  { %v219_v44 = vadd.f32 %v917_v34, %v218_v43 }
  0xed   :  { %v288_v45 = vmax.f32 %v219_v44, 0.0 }
  0xef   :  { %382 = vmatmul.f32.gmra.mxu1 %v288_v45 }
  0xf2   :  { %v221_v46 = vpop.f32.mrf.mxu0 }
  0xf3   :  { %v222_v47 = vadd.f32 %v917_v34, %v221_v46 }
  0xf5   :  { %v289_v48 = vmax.f32 %v222_v47, 0.0 }
  0xf7   :  { %385 = vmatmul.f32.gmra.mxu1 %v289_v48  ;;  %v260_v48 = vpop.f32.mrf.mxu3 }
  0xfa   :  { %v224_v49 = vpop.f32.mrf.mxu0 }
  0xfb   :  { %v225_v50 = vadd.f32 %v917_v34, %v224_v49 }
  0xfd   :  { %v290_v51 = vmax.f32 %v225_v50, 0.0 }
  0xff   :  { %388 = vmatmul.f32.gmra.mxu1 %v290_v51 }
 0x102   :  { %v227_v53 = vpop.f32.mrf.mxu0 }
 0x103   :  { %v228_v54 = vadd.f32 %v917_v34, %v227_v53  ;;  %v258_v53 = vadd.f32 %v917_v34, %v257_v39 }
 0x104   :  { %v344_v55 = vpop.f32.mrf.mxu1 }
 0x105   :  { %v291_v56 = vmax.f32 %v228_v54, 0.0  ;;  %v345_v57 = vadd.f32 %v1050_v52, %v344_v55  ;;  %v301_v54 = vmax.f32 %v258_v53, 0.0 }
 0x107   :  { %v440_v58 = vmax.f32 %v345_v57, 0.0  ;;  %391 = vmatmul.f32.gmra.mxu1 %v291_v56  ;;  %v263_v57 = vpop.f32.mrf.mxu3 }
 0x109   :  { %508 = vmatmul.f32.vlgmr.msra.gmra.mxu2 %v440_v58 }
 0x10a   :  { %v230_v59 = vpop.f32.mrf.mxu0 }
 0x10b   :  { %v231_v60 = vadd.f32 %v917_v34, %v230_v59  ;;  %v261_v59 = vadd.f32 %v917_v34, %v260_v48 }
 0x10c   :  { %v347_v61 = vpop.f32.mrf.mxu1 }
 0x10d   :  { %v292_v62 = vmax.f32 %v231_v60, 0.0  ;;  %v348_v63 = vadd.f32 %v1050_v52, %v347_v61  ;;  %v302_v60 = vmax.f32 %v261_v59, 0.0 }
 0x10f   :  { %v441_v0 = vmax.f32 %v348_v63, 0.0  ;;  %394 = vmatmul.f32.gmra.mxu1 %v292_v62 }
 0x111   :  { %511 = vmatmul.f32.gmra.mxu2 %v441_v0  ;;  %v264_v0 = vadd.f32 %v917_v34, %v263_v57 }
 0x112   :  { %v233_v1 = vpop.f32.mrf.mxu0 }
 0x113   :  { %v234_v2 = vadd.f32 %v917_v34, %v233_v1  ;;  %v266_v1 = vpop.f32.mrf.mxu3 }
 0x114   :  { %v350_v3 = vpop.f32.mrf.mxu1 }
 0x115   :  { %v293_v4 = vmax.f32 %v234_v2, 0.0  ;;  %v351_v5 = vadd.f32 %v1050_v52, %v350_v3  ;;  %v303_v2 = vmax.f32 %v264_v0, 0.0 }
 0x117   :  { %v442_v6 = vmax.f32 %v351_v5, 0.0  ;;  %397 = vmatmul.f32.gmra.mxu1 %v293_v4 }
 0x119   :  { %514 = vmatmul.f32.gmra.mxu2 %v442_v6  ;;  %v267_v6 = vadd.f32 %v917_v34, %v266_v1 }
 0x11a   :  { %v236_v7 = vpop.f32.mrf.mxu0 }
 0x11b   :  { %v237_v8 = vadd.f32 %v917_v34, %v236_v7  ;;  %v269_v7 = vpop.f32.mrf.mxu3 }
 0x11c   :  { %v353_v9 = vpop.f32.mrf.mxu1 }
 0x11d   :  { %v294_v10 = vmax.f32 %v237_v8, 0.0  ;;  %v354_v11 = vadd.f32 %v1050_v52, %v353_v9  ;;  %v304_v8 = vmax.f32 %v267_v6, 0.0 }
 0x11f   :  { %v443_v12 = vmax.f32 %v354_v11, 0.0  ;;  %400 = vmatmul.f32.gmra.mxu1 %v294_v10 }
 0x121   :  { %517 = vmatmul.f32.gmra.mxu2 %v443_v12  ;;  %v270_v12 = vadd.f32 %v917_v34, %v269_v7 }
 0x122   :  { %v239_v13 = vpop.f32.mrf.mxu0 }
 0x123   :  { %v240_v14 = vadd.f32 %v917_v34, %v239_v13  ;;  %v305_v13 = vmax.f32 %v270_v12, 0.0 }
 0x124   :  { %v356_v15 = vpop.f32.mrf.mxu1 }
 0x125   :  { %v295_v16 = vmax.f32 %v240_v14, 0.0  ;;  %v357_v17 = vadd.f32 %v1050_v52, %v356_v15  ;;  %v272_v15 = vpop.f32.mrf.mxu3 }
 0x127   :  { %v444_v18 = vmax.f32 %v357_v17, 0.0  ;;  %403 = vmatmul.f32.gmra.mxu1 %v295_v16 }
 0x129   :  { %520 = vmatmul.f32.gmra.mxu2 %v444_v18  ;;  %v273_v18 = vadd.f32 %v917_v34, %v272_v15 }
 0x12a   :  { %v242_v19 = vpop.f32.mrf.mxu0 }
 0x12b   :  { %v243_v20 = vadd.f32 %v917_v34, %v242_v19  ;;  %v306_v19 = vmax.f32 %v273_v18, 0.0 }
 0x12c   :  { %v359_v21 = vpop.f32.mrf.mxu1 }
 0x12d   :  { %v296_v22 = vmax.f32 %v243_v20, 0.0  ;;  %v360_v23 = vadd.f32 %v1050_v52, %v359_v21 }
 0x12f   :  { %v445_v24 = vmax.f32 %v360_v23, 0.0  ;;  %406 = vmatmul.f32.gmra.mxu1 %v296_v22 }
 0x131   :  { %523 = vmatmul.f32.gmra.mxu2 %v445_v24 }
 0x132   :  { %v245_v25 = vpop.f32.mrf.mxu0 }
 0x133   :  { %v246_v26 = vadd.f32 %v917_v34, %v245_v25 }
 0x134   :  { %v362_v27 = vpop.f32.mrf.mxu1 }
 0x135   :  { %v297_v28 = vmax.f32 %v246_v26, 0.0  ;;  %v363_v29 = vadd.f32 %v1050_v52, %v362_v27  ;;  %v1088_v26 = vld [vmem:[%s1146_s6] ss:$0 sm:$0xff]  ;;  %s753_s6 = smov [#allocation2]  }
 0x136   :  { %s641_s1 = sshll.u32 %s753_s6, 4  ;;  %s642_s1 = int_to_ptr.vmem [resolvable:$true] %s641_s1 }
 0x137   :  { %v446_v30 = vmax.f32 %v363_v29, 0.0  ;;  %409 = vmatmul.f32.gmra.mxu1 %v297_v28 }
 0x139   :  { %526 = vmatmul.f32.gmra.mxu2 %v446_v30 }
 0x13a   :  { %v248_v31 = vpop.f32.mrf.mxu0 }
 0x13b   :  { %v249_v32 = vadd.f32 %v917_v34, %v248_v31 }
 0x13c   :  { %v365_v33 = vpop.f32.mrf.mxu1 }
 0x13d   :  { %v298_v35 = vmax.f32 %v249_v32, 0.0  ;;  %v366_v36 = vadd.f32 %v1050_v52, %v365_v33 }
 0x13f   :  { %v447_v37 = vmax.f32 %v366_v36, 0.0  ;;  %412 = vmatmul.f32.gmra.mxu1 %v298_v35 }
 0x141   :  { %529 = vmatmul.f32.gmra.mxu2 %v447_v37 }
 0x142   :  { %v251_v38 = vpop.f32.mrf.mxu0 }
 0x143   :  { %v252_v40 = vadd.f32 %v917_v34, %v251_v38 }
 0x144   :  { %v368_v41 = vpop.f32.mrf.mxu1 }
 0x145   :  { %v299_v42 = vmax.f32 %v252_v40, 0.0  ;;  %v369_v43 = vadd.f32 %v1050_v52, %v368_v41 }
 0x147   :  { %v448_v44 = vmax.f32 %v369_v43, 0.0  ;;  %415 = vmatmul.f32.vlgmr.msrb.gmra.mxu3 %v299_v42 }
 0x149   :  { %532 = vmatmul.f32.gmra.mxu2 %v448_v44 }
 0x14a   :  { %v254_v45 = vpop.f32.mrf.mxu0 }
 0x14b   :  { %v255_v46 = vadd.f32 %v917_v34, %v254_v45 }
 0x14c   :  { %v371_v47 = vpop.f32.mrf.mxu1 }
 0x14d   :  { %v300_v49 = vmax.f32 %v255_v46, 0.0  ;;  %v372_v50 = vadd.f32 %v1050_v52, %v371_v47 }
 0x14f   :  { %v449_v51 = vmax.f32 %v372_v50, 0.0  ;;  %418 = vmatmul.f32.gmra.mxu3 %v300_v49 }
 0x151   :  { %535 = vmatmul.f32.gmra.mxu2 %v449_v51 }
 0x154   :  { %v374_v55 = vpop.f32.mrf.mxu1 }
 0x155   :  { %v375_v56 = vadd.f32 %v1050_v52, %v374_v55 }
 0x157   :  { %v450_v58 = vmax.f32 %v375_v56, 0.0  ;;  %421 = vmatmul.f32.gmra.mxu3 %v301_v54 }
 0x159   :  { %538 = vmatmul.f32.gmra.mxu2 %v450_v58 }
 0x15c   :  { %v377_v61 = vpop.f32.mrf.mxu1 }
 0x15d   :  { %v378_v62 = vadd.f32 %v1050_v52, %v377_v61 }
 0x15f   :  { %v451_v63 = vmax.f32 %v378_v62, 0.0  ;;  %424 = vmatmul.f32.gmra.mxu3 %v302_v60 }
 0x161   :  { %541 = vmatmul.f32.gmra.mxu2 %v451_v63 }
 0x164   :  { %v380_v3 = vpop.f32.mrf.mxu1 }
 0x165   :  { %v381_v4 = vadd.f32 %v1050_v52, %v380_v3 }
 0x167   :  { %v452_v5 = vmax.f32 %v381_v4, 0.0  ;;  %427 = vmatmul.f32.gmra.mxu3 %v303_v2 }
 0x169   :  { %544 = vmatmul.f32.gmra.mxu2 %v452_v5 }
 0x16c   :  { %v383_v9 = vpop.f32.mrf.mxu1 }
 0x16d   :  { %v384_v10 = vadd.f32 %v1050_v52, %v383_v9 }
 0x16f   :  { %v453_v11 = vmax.f32 %v384_v10, 0.0  ;;  %430 = vmatmul.f32.gmra.mxu3 %v304_v8 }
 0x171   :  { %547 = vmatmul.f32.gmra.mxu2 %v453_v11 }
 0x174   :  { %v386_v14 = vpop.f32.mrf.mxu1 }
 0x175   :  { %v387_v16 = vadd.f32 %v1050_v52, %v386_v14 }
 0x177   :  { %v454_v17 = vmax.f32 %v387_v16, 0.0  ;;  %433 = vmatmul.f32.gmra.mxu3 %v305_v13 }
 0x179   :  { %550 = vmatmul.f32.gmra.mxu2 %v454_v17 }
 0x17c   :  { %v389_v20 = vpop.f32.mrf.mxu1 }
 0x17d   :  { %v390_v21 = vadd.f32 %v1050_v52, %v389_v20 }
 0x17f   :  { %v455_v22 = vmax.f32 %v390_v21, 0.0  ;;  %436 = vmatmul.f32.gmra.mxu3 %v306_v19 }
 0x181   :  { %553 = vmatmul.f32.gmra.mxu2 %v455_v22 }
 0x184   :  { %v392_v23 = vpop.f32.mrf.mxu1 }
 0x185   :  { %v393_v24 = vadd.f32 %v1050_v52, %v392_v23 }
 0x187   :  { %v456_v25 = vmax.f32 %v393_v24, 0.0 }
 0x189   :  { %556 = vmatmul.f32.gmra.mxu2 %v456_v25 }
 0x18c   :  { %v395_v27 = vpop.f32.mrf.mxu1  ;;  %v509_v34 = vpop.f32.mrf.mxu2 }
 0x18d   :  { %v396_v28 = vadd.f32 %v1050_v52, %v395_v27  ;;  %v510_v29 = vadd.f32 %v1088_v26, %v509_v34 }
 0x18f   :  { %v457_v30 = vmax.f32 %v396_v28, 0.0  ;;  %605 = vst [vmem:[#allocation2] sm:$0xff] %v510_v29 }
 0x191   :  { %559 = vmatmul.f32.gmra.mxu2 %v457_v30 }
 0x194   :  { %v398_v31 = vpop.f32.mrf.mxu1  ;;  %v512_v32 = vpop.f32.mrf.mxu2 }
 0x195   :  { %v399_v33 = vadd.f32 %v1050_v52, %v398_v31  ;;  %v513_v35 = vadd.f32 %v1088_v26, %v512_v32 }
 0x197   :  { %v458_v36 = vmax.f32 %v399_v33, 0.0  ;;  %606 = vst [vmem:[#allocation2 + $0x8] sm:$0xff] %v513_v35 }
 0x199   :  { %562 = vmatmul.f32.gmra.mxu2 %v458_v36 }
 0x19c   :  { %v401_v37 = vpop.f32.mrf.mxu1  ;;  %v515_v38 = vpop.f32.mrf.mxu2 }
 0x19d   :  { %v402_v39 = vadd.f32 %v1050_v52, %v401_v37  ;;  %v516_v40 = vadd.f32 %v1088_v26, %v515_v38 }
 0x19f   :  { %v459_v41 = vmax.f32 %v402_v39, 0.0  ;;  %607 = vst [vmem:[#allocation2 + $0x10] sm:$0xff] %v516_v40 }
 0x1a1   :  { %565 = vmatmul.f32.gmra.mxu2 %v459_v41 }
 0x1a4   :  { %v404_v42 = vpop.f32.mrf.mxu1  ;;  %v518_v43 = vpop.f32.mrf.mxu2 }
 0x1a5   :  { %v405_v44 = vadd.f32 %v1050_v52, %v404_v42  ;;  %v519_v45 = vadd.f32 %v1088_v26, %v518_v43 }
 0x1a7   :  { %v460_v46 = vmax.f32 %v405_v44, 0.0  ;;  %608 = vst [vmem:[#allocation2 + $0x18] sm:$0xff] %v519_v45 }
 0x1a9   :  { %568 = vmatmul.f32.gmra.mxu2 %v460_v46 }
 0x1ac   :  { %v407_v47 = vpop.f32.mrf.mxu1  ;;  %v521_v48 = vpop.f32.mrf.mxu2 }
 0x1ad   :  { %v408_v49 = vadd.f32 %v1050_v52, %v407_v47  ;;  %v522_v50 = vadd.f32 %v1088_v26, %v521_v48 }
 0x1af   :  { %v461_v51 = vmax.f32 %v408_v49, 0.0  ;;  %609 = vst [vmem:[#allocation2 + $0x20] sm:$0xff] %v522_v50 }
 0x1b1   :  { %571 = vmatmul.f32.gmra.mxu2 %v461_v51 }
 0x1b4   :  { %v410_v53 = vpop.f32.mrf.mxu1  ;;  %v524_v54 = vpop.f32.mrf.mxu2 }
 0x1b5   :  { %v411_v55 = vadd.f32 %v1050_v52, %v410_v53  ;;  %v525_v56 = vadd.f32 %v1088_v26, %v524_v54 }
 0x1b7   :  { %v462_v57 = vmax.f32 %v411_v55, 0.0  ;;  %610 = vst [vmem:[#allocation2 + $0x28] sm:$0xff] %v525_v56 }
 0x1b9   :  { %574 = vmatmul.f32.gmra.mxu2 %v462_v57 }
 0x1bc   :  { %v413_v58 = vpop.f32.mrf.mxu1  ;;  %v527_v59 = vpop.f32.mrf.mxu2 }
 0x1bd   :  { %v414_v60 = vadd.f32 %v1050_v52, %v413_v58  ;;  %v528_v61 = vadd.f32 %v1088_v26, %v527_v59 }
 0x1bf   :  { %v463_v62 = vmax.f32 %v414_v60, 0.0  ;;  %611 = vst [vmem:[#allocation2 + $0x30] sm:$0xff] %v528_v61 }
 0x1c1   :  { %577 = vmatmul.f32.gmra.mxu2 %v463_v62 }
 0x1c4   :  { %v530_v63 = vpop.f32.mrf.mxu2 }
 0x1c5   :  { %v531_v0 = vadd.f32 %v1088_v26, %v530_v63 }
 0x1c7   :  { %612 = vst [vmem:[#allocation2 + $0x38] sm:$0xff] %v531_v0 }
 0x1ca   :  { %v416_v1 = vpop.f32.mrf.mxu3 }
 0x1cb   :  { %v417_v2 = vadd.f32 %v1050_v52, %v416_v1 }
 0x1cc   :  { %v533_v3 = vpop.f32.mrf.mxu2 }
 0x1cd   :  { %v464_v4 = vmax.f32 %v417_v2, 0.0  ;;  %v534_v5 = vadd.f32 %v1088_v26, %v533_v3 }
 0x1cf   :  { %613 = vst [vmem:[#allocation2 + $0x40] sm:$0xff] %v534_v5  ;;  %580 = vmatmul.f32.vlgmr.msra.gmra.mxu3 %v464_v4 }
 0x1d2   :  { %v419_v6 = vpop.f32.mrf.mxu3 }
 0x1d3   :  { %v420_v7 = vadd.f32 %v1050_v52, %v419_v6 }
 0x1d4   :  { %v536_v8 = vpop.f32.mrf.mxu2 }
 0x1d5   :  { %v465_v9 = vmax.f32 %v420_v7, 0.0  ;;  %v537_v10 = vadd.f32 %v1088_v26, %v536_v8 }
 0x1d7   :  { %614 = vst [vmem:[#allocation2 + $0x48] sm:$0xff] %v537_v10  ;;  %583 = vmatmul.f32.gmra.mxu3 %v465_v9 }
 0x1da   :  { %v422_v11 = vpop.f32.mrf.mxu3 }
 0x1db   :  { %v423_v12 = vadd.f32 %v1050_v52, %v422_v11 }
 0x1dc   :  { %v539_v13 = vpop.f32.mrf.mxu2 }
 0x1dd   :  { %v466_v14 = vmax.f32 %v423_v12, 0.0  ;;  %v540_v15 = vadd.f32 %v1088_v26, %v539_v13 }
 0x1df   :  { %615 = vst [vmem:[#allocation2 + $0x50] sm:$0xff] %v540_v15  ;;  %586 = vmatmul.f32.gmra.mxu3 %v466_v14 }
 0x1e2   :  { %v425_v16 = vpop.f32.mrf.mxu3 }
 0x1e3   :  { %v426_v17 = vadd.f32 %v1050_v52, %v425_v16 }
 0x1e4   :  { %v542_v18 = vpop.f32.mrf.mxu2 }
 0x1e5   :  { %v467_v19 = vmax.f32 %v426_v17, 0.0  ;;  %v543_v20 = vadd.f32 %v1088_v26, %v542_v18 }
 0x1e7   :  { %616 = vst [vmem:[#allocation2 + $0x58] sm:$0xff] %v543_v20  ;;  %589 = vmatmul.f32.gmra.mxu3 %v467_v19 }
 0x1ea   :  { %v428_v21 = vpop.f32.mrf.mxu3 }
 0x1eb   :  { %v429_v22 = vadd.f32 %v1050_v52, %v428_v21 }
 0x1ec   :  { %v545_v23 = vpop.f32.mrf.mxu2 }
 0x1ed   :  { %v468_v24 = vmax.f32 %v429_v22, 0.0  ;;  %v546_v25 = vadd.f32 %v1088_v26, %v545_v23 }
 0x1ef   :  { %617 = vst [vmem:[#allocation2 + $0x60] sm:$0xff] %v546_v25  ;;  %592 = vmatmul.f32.gmra.mxu3 %v468_v24 }
 0x1f2   :  { %v431_v27 = vpop.f32.mrf.mxu3 }
 0x1f3   :  { %v432_v34 = vadd.f32 %v1050_v52, %v431_v27 }
 0x1f4   :  { %v548_v28 = vpop.f32.mrf.mxu2 }
 0x1f5   :  { %v469_v29 = vmax.f32 %v432_v34, 0.0  ;;  %v549_v30 = vadd.f32 %v1088_v26, %v548_v28 }
 0x1f7   :  { %618 = vst [vmem:[#allocation2 + $0x68] sm:$0xff] %v549_v30  ;;  %595 = vmatmul.f32.gmra.mxu3 %v469_v29 }
 0x1fa   :  { %v434_v31 = vpop.f32.mrf.mxu3 }
 0x1fb   :  { %v435_v32 = vadd.f32 %v1050_v52, %v434_v31 }
 0x1fc   :  { %v551_v33 = vpop.f32.mrf.mxu2 }
 0x1fd   :  { %v470_v35 = vmax.f32 %v435_v32, 0.0  ;;  %v552_v36 = vadd.f32 %v1088_v26, %v551_v33 }
 0x1ff   :  { %619 = vst [vmem:[#allocation2 + $0x70] sm:$0xff] %v552_v36  ;;  %598 = vmatmul.f32.gmra.mxu3 %v470_v35 }
 0x202   :  { %v437_v37 = vpop.f32.mrf.mxu3 }
 0x203   :  { %v438_v38 = vadd.f32 %v1050_v52, %v437_v37 }
 0x204   :  { %v554_v39 = vpop.f32.mrf.mxu2 }
 0x205   :  { %v471_v40 = vmax.f32 %v438_v38, 0.0  ;;  %v555_v41 = vadd.f32 %v1088_v26, %v554_v39 }
 0x207   :  { %620 = vst [vmem:[#allocation2 + $0x78] sm:$0xff] %v555_v41  ;;  %601 = vmatmul.f32.gmra.mxu3 %v471_v40 }
 0x20c   :  { %v557_v42 = vpop.f32.mrf.mxu2 }
 0x20d   :  { %v558_v43 = vadd.f32 %v1088_v26, %v557_v42 }
 0x20f   :  { %621 = vst [vmem:[#allocation2 + $0x80] sm:$0xff] %v558_v43 }
 0x214   :  { %v560_v44 = vpop.f32.mrf.mxu2 }
 0x215   :  { %v561_v45 = vadd.f32 %v1088_v26, %v560_v44 }
 0x217   :  { %622 = vst [vmem:[#allocation2 + $0x88] sm:$0xff] %v561_v45 }
 0x21c   :  { %v563_v46 = vpop.f32.mrf.mxu2 }
 0x21d   :  { %v564_v47 = vadd.f32 %v1088_v26, %v563_v46 }
 0x21f   :  { %623 = vst [vmem:[#allocation2 + $0x90] sm:$0xff] %v564_v47 }
 0x224   :  { %v566_v48 = vpop.f32.mrf.mxu2 }
 0x225   :  { %v567_v52 = vadd.f32 %v1088_v26, %v566_v48 }
 0x227   :  { %624 = vst [vmem:[#allocation2 + $0x98] sm:$0xff] %v567_v52 }
 0x22c   :  { %v569_v49 = vpop.f32.mrf.mxu2 }
 0x22d   :  { %v570_v50 = vadd.f32 %v1088_v26, %v569_v49 }
 0x22f   :  { %625 = vst [vmem:[#allocation2 + $0xa0] sm:$0xff] %v570_v50 }
 0x234   :  { %v572_v51 = vpop.f32.mrf.mxu2 }
 0x235   :  { %v573_v53 = vadd.f32 %v1088_v26, %v572_v51 }
 0x237   :  { %626 = vst [vmem:[#allocation2 + $0xa8] sm:$0xff] %v573_v53 }
 0x23c   :  { %v575_v54 = vpop.f32.mrf.mxu2 }
 0x23d   :  { %v576_v55 = vadd.f32 %v1088_v26, %v575_v54 }
 0x23f   :  { %627 = vst [vmem:[#allocation2 + $0xb0] sm:$0xff] %v576_v55 }
 0x244   :  { %v578_v56 = vpop.f32.mrf.mxu2 }
 0x245   :  { %v579_v57 = vadd.f32 %v1088_v26, %v578_v56 }
 0x247   :  { %628 = vst [vmem:[#allocation2 + $0xb8] sm:$0xff] %v579_v57 }
 0x252   :  { %v581_v58 = vpop.f32.mrf.mxu3 }
 0x253   :  { %v582_v59 = vadd.f32 %v1088_v26, %v581_v58 }
 0x255   :  { %629 = vst [vmem:[#allocation2 + $0xc0] sm:$0xff] %v582_v59 }
 0x25a   :  { %v584_v60 = vpop.f32.mrf.mxu3 }
 0x25b   :  { %v585_v61 = vadd.f32 %v1088_v26, %v584_v60 }
 0x25d   :  { %630 = vst [vmem:[#allocation2 + $0xc8] sm:$0xff] %v585_v61 }
 0x262   :  { %v587_v62 = vpop.f32.mrf.mxu3 }
 0x263   :  { %v588_v63 = vadd.f32 %v1088_v26, %v587_v62 }
 0x265   :  { %631 = vst [vmem:[#allocation2 + $0xd0] sm:$0xff] %v588_v63 }
 0x26a   :  { %v590_v0 = vpop.f32.mrf.mxu3 }
 0x26b   :  { %v591_v1 = vadd.f32 %v1088_v26, %v590_v0 }
 0x26d   :  { %632 = vst [vmem:[#allocation2 + $0xd8] sm:$0xff] %v591_v1 }
 0x272   :  { %v593_v2 = vpop.f32.mrf.mxu3 }
 0x273   :  { %v594_v3 = vadd.f32 %v1088_v26, %v593_v2 }
 0x275   :  { %633 = vst [vmem:[#allocation2 + $0xe0] sm:$0xff] %v594_v3 }
 0x27a   :  { %v596_v4 = vpop.f32.mrf.mxu3 }
 0x27b   :  { %v597_v5 = vadd.f32 %v1088_v26, %v596_v4 }
 0x27d   :  { %634 = vst [vmem:[#allocation2 + $0xe8] sm:$0xff] %v597_v5 }
 0x282   :  { %v599_v6 = vpop.f32.mrf.mxu3 }
 0x283   :  { %v600_v7 = vadd.f32 %v1088_v26, %v599_v6 }
 0x285   :  { %635 = vst [vmem:[#allocation2 + $0xf0] sm:$0xff] %v600_v7 }
 0x28a   :  { %v602_v8 = vpop.f32.mrf.mxu3 }
 0x28b   :  { %v603_v9 = vadd.f32 %v1088_v26, %v602_v8 }
 0x28d   :  { %636 = vst [vmem:[#allocation2 + $0xf8] sm:$0xff] %v603_v9 }
 0x28e   :  { %649 = dma.vmem_to_hbm [thread:$0]  %s642_s1, 4096, %s644_s12, [#allocation3], %s754_s13, %s754_s13, %s755_s14  }
 0x28f   :  { %751 = dma.done.wait [#allocation3], 4096  }
 0x290   :  { %752 = vsyncadd [#allocation3], 4294963200 }
 0x291   :  { %654 = vsyncpa [#allocation3], 1 }

// kernel: tpu_custom_call.1
= control target key start
LH: loop header
LB: loop body
LE: loop exit
PB: predicated region body
PF: predicated region fallthrough
CT: control target
= control target key end

     0   :  { %vm65_vm0 = vcmask 130048   ;;  %s1140_s0 = inlined_call_operand.vmem [shape: f32[256,16], index: 0, kind: input, shape index: {}]   ;;  %s1141_s1 = inlined_call_operand.vmem [shape: f32[16,128], index: 1, kind: input, shape index: {}]   ;;  %s1142_s2 = inlined_call_operand.vmem [shape: f32[1,128], index: 2, kind: input, shape index: {}]   ;;  %s1143_s3 = inlined_call_operand.vmem [shape: f32[128,128], index: 3, kind: input, shape index: {}]   ;;  %s1144_s4 = inlined_call_operand.vmem [shape: f32[1,128], index: 4, kind: input, shape index: {}]   ;;  %s1145_s5 = inlined_call_operand.vmem [shape: f32[128,128], index: 5, kind: input, shape index: {}]   ;;  %s1146_s6 = inlined_call_operand.vmem [shape: f32[1,128], index: 6, kind: input, shape index: {}]   ;;  %s1147_s7 = inlined_call_operand.hbm [shape: f32[256,128], index: 7, kind: output, shape index: {}]  }
   0x1   :  { %v60_v0 = vld [vmem:[%s1141_s1 + $0x8] sm:$0xff]  ;;  %v59_v1 = vld [vmem:[%s1141_s1] sm:$0xff] }
   0x2   :  { %176 = vmatpush.msra.mxu0 %v60_v0  ;;  %v27_v2 = vld [vmem:[%s1140_s0] sm:$0xff]  ;;  %687 = vmatpush.msra.mxu3 %v60_v0 }
   0x4   :  { %177 = vmatpush.msra.mxu0 %v59_v1  ;;  %688 = vmatpush.msra.mxu3 %v59_v1 }
   0x5   :  { %12 = vsyncpa [#allocation3], 0  ;;  %655 = vmatmul.msk.f32.vlgmr.msra.gmra.mxu0 %vm65_vm0, %v27_v2  ;;  %v28_v3 = vld [vmem:[%s1140_s0 + $0x8] sm:$0xff]  ;;  %v29_v4 = vld [vmem:[%s1140_s0 + $0x10] sm:$0xff]  ;;  %s643_s12 = sshll.u32 %s1147_s7, 4  ;;  %s754_s13 = smov 128   ;;  %s644_s12 = int_to_ptr.hbm [resolvable:$true] %s643_s12 }
   0x6   :  { %v30_v5 = vld [vmem:[%s1140_s0 + $0x18] sm:$0xff]  ;;  %v31_v6 = vld [vmem:[%s1140_s0 + $0x20] sm:$0xff]  ;;  %v32_v7 = vld [vmem:[%s1140_s0 + $0x28] sm:$0xff]  ;;  %s755_s14 = smov 8  }
   0x7   :  { %v33_v8 = vld [vmem:[%s1140_s0 + $0x30] sm:$0xff]  ;;  %v34_v9 = vld [vmem:[%s1140_s0 + $0x38] sm:$0xff]  ;;  %v35_v10 = vld [vmem:[%s1140_s0 + $0x40] sm:$0xff] }
   0x8   :  { %v322_v11 = vld [vmem:[%s1143_s3 + $0x78] sm:$0xff]  ;;  %v321_v12 = vld [vmem:[%s1143_s3 + $0x70] sm:$0xff]  ;;  %v320_v13 = vld [vmem:[%s1143_s3 + $0x68] sm:$0xff] }
   0x9   :  { %327 = vmatpush.msra.mxu1 %v322_v11  ;;  %689 = vmatpush.msrb.mxu3 %v322_v11  ;;  %v36_v14 = vld [vmem:[%s1140_s0 + $0x48] sm:$0xff]  ;;  %v319_v15 = vld [vmem:[%s1143_s3 + $0x60] sm:$0xff]  ;;  %v318_v16 = vld [vmem:[%s1143_s3 + $0x58] sm:$0xff] }
   0xa   :  { %v317_v17 = vld [vmem:[%s1143_s3 + $0x50] sm:$0xff]  ;;  %v316_v18 = vld [vmem:[%s1143_s3 + $0x48] sm:$0xff]  ;;  %v315_v20 = vld [vmem:[%s1143_s3 + $0x40] sm:$0xff] }
   0xb   :  { %328 = vmatpush.msra.mxu1 %v321_v12  ;;  %690 = vmatpush.msrb.mxu3 %v321_v12  ;;  %v37_v19 = vld [vmem:[%s1140_s0 + $0x50] sm:$0xff]  ;;  %v314_v21 = vld [vmem:[%s1143_s3 + $0x38] sm:$0xff]  ;;  %v312_v23 = vld [vmem:[%s1143_s3 + $0x28] sm:$0xff] }
   0xc   :  { %v313_v22 = vld [vmem:[%s1143_s3 + $0x30] sm:$0xff]  ;;  %v38_v24 = vld [vmem:[%s1140_s0 + $0x58] sm:$0xff]  ;;  %v311_v25 = vld [vmem:[%s1143_s3 + $0x20] sm:$0xff] }
   0xd   :  { %656 = vmatmul.msk.f32.gmra.mxu0 %vm65_vm0, %v28_v3  ;;  %329 = vmatpush.msra.mxu1 %v320_v13  ;;  %v310_v26 = vld [vmem:[%s1143_s3 + $0x18] sm:$0xff]  ;;  %v309_v27 = vld [vmem:[%s1143_s3 + $0x10] sm:$0xff]  ;;  %v39_v28 = vld [vmem:[%s1140_s0 + $0x60] sm:$0xff] }
   0xe   :  { %691 = vmatpush.msrb.mxu3 %v320_v13  ;;  %v308_v29 = vld [vmem:[%s1143_s3 + $0x8] sm:$0xff]  ;;  %v307_v30 = vld [vmem:[%s1143_s3] sm:$0xff]  ;;  %v41_v32 = vld [vmem:[%s1140_s0 + $0x70] sm:$0xff] }
   0xf   :  { %330 = vmatpush.msra.mxu1 %v319_v15  ;;  %v40_v31 = vld [vmem:[%s1140_s0 + $0x68] sm:$0xff]  ;;  %v42_v33 = vld [vmem:[%s1140_s0 + $0x78] sm:$0xff]  ;;  %v917_v34 = vld [vmem:[%s1142_s2] ss:$0 sm:$0xff] }
  0x10   :  { %692 = vmatpush.msrb.mxu3 %v319_v15  ;;  %v43_v36 = vld [vmem:[%s1140_s0 + $0x80] sm:$0xff]  ;;  %v44_v40 = vld [vmem:[%s1140_s0 + $0x88] sm:$0xff]  ;;  %v45_v44 = vld [vmem:[%s1140_s0 + $0x90] sm:$0xff] }
  0x11   :  { %331 = vmatpush.msra.mxu1 %v318_v16  ;;  %v46_v48 = vld [vmem:[%s1140_s0 + $0x98] sm:$0xff]  ;;  %v47_v52 = vld [vmem:[%s1140_s0 + $0xa0] sm:$0xff]  ;;  %v48_v56 = vld [vmem:[%s1140_s0 + $0xa8] sm:$0xff] }
  0x12   :  { %693 = vmatpush.msrb.mxu3 %v318_v16  ;;  %v53_v59 = vld [vmem:[%s1140_s0 + $0xd0] sm:$0xff]  ;;  %v54_v0 = vld [vmem:[%s1140_s0 + $0xd8] sm:$0xff]  ;;  %v52_v13 = vld [vmem:[%s1140_s0 + $0xc8] sm:$0xff] }
  0x13   :  { %332 = vmatpush.msra.mxu1 %v317_v17  ;;  %681 = vmatmul.msk.f32.vlgmr.msra.gmra.mxu3 %vm65_vm0, %v53_v59  ;;  %v49_v61 = vld [vmem:[%s1140_s0 + $0xb0] sm:$0xff]  ;;  %v50_v2 = vld [vmem:[%s1140_s0 + $0xb8] sm:$0xff] }
  0x14   :  { %694 = vmatpush.msrb.mxu3 %v317_v17  ;;  %v487_v11 = vld [vmem:[%s1145_s5 + $0x78] sm:$0xff]  ;;  %v486_v15 = vld [vmem:[%s1145_s5 + $0x70] sm:$0xff]  ;;  %v485_v17 = vld [vmem:[%s1145_s5 + $0x68] sm:$0xff] }
  0x15   :  { %657 = vmatmul.msk.f32.gmra.mxu0 %vm65_vm0, %v29_v4  ;;  %333 = vmatpush.msra.mxu1 %v316_v18 }
  0x16   :  { %695 = vmatpush.msrb.mxu3 %v316_v18  ;;  %492 = vmatpush.msra.mxu2 %v487_v11  ;;  %v57_v18 = vld [vmem:[%s1140_s0 + $0xf0] sm:$0xff] }
  0x17   :  { %334 = vmatpush.msra.mxu1 %v315_v20 }
  0x18   :  { %696 = vmatpush.msrb.mxu3 %v315_v20  ;;  %493 = vmatpush.msra.mxu2 %v486_v15  ;;  %v483_v20 = vld [vmem:[%s1145_s5 + $0x58] sm:$0xff] }
  0x19   :  { %335 = vmatpush.msra.mxu1 %v314_v21 }
  0x1a   :  { %697 = vmatpush.msrb.mxu3 %v314_v21  ;;  %494 = vmatpush.msra.mxu2 %v485_v17 }
  0x1b   :  { %336 = vmatpush.msra.mxu1 %v313_v22  ;;  %682 = vmatmul.msk.f32.gmra.mxu3 %vm65_vm0, %v54_v0 }
  0x1c   :  { %698 = vmatpush.msrb.mxu3 %v313_v22 }
  0x1d   :  { %658 = vmatmul.msk.f32.gmra.mxu0 %vm65_vm0, %v30_v5  ;;  %337 = vmatpush.msra.mxu1 %v312_v23  ;;  %v55_v5 = vld [vmem:[%s1140_s0 + $0xe0] sm:$0xff] }
  0x1e   :  { %699 = vmatpush.msrb.mxu3 %v312_v23  ;;  %v482_v23 = vld [vmem:[%s1145_s5 + $0x50] sm:$0xff] }
  0x1f   :  { %338 = vmatpush.msra.mxu1 %v311_v25 }
  0x20   :  { %700 = vmatpush.msrb.mxu3 %v311_v25  ;;  %v481_v25 = vld [vmem:[%s1145_s5 + $0x48] sm:$0xff] }
  0x21   :  { %339 = vmatpush.msra.mxu1 %v310_v26 }
  0x22   :  { %701 = vmatpush.msrb.mxu3 %v310_v26  ;;  %v58_v26 = vld [vmem:[%s1140_s0 + $0xf8] sm:$0xff] }
  0x23   :  { %340 = vmatpush.msra.mxu1 %v309_v27  ;;  %683 = vmatmul.msk.f32.gmra.mxu3 %vm65_vm0, %v55_v5 }
  0x24   :  { %702 = vmatpush.msrb.mxu3 %v309_v27  ;;  %v480_v27 = vld [vmem:[%s1145_s5 + $0x40] sm:$0xff] }
  0x25   :  { %659 = vmatmul.msk.f32.gmra.mxu0 %vm65_vm0, %v31_v6  ;;  %341 = vmatpush.msra.mxu1 %v308_v29 }
  0x26   :  { %703 = vmatpush.msrb.mxu3 %v308_v29 }
  0x27   :  { %342 = vmatpush.msra.mxu1 %v307_v30 }
  0x28   :  { %704 = vmatpush.msrb.mxu3 %v307_v30 }
  0x2a   :  { %705 = vmatpush.msra.mxu3 %v487_v11 }
  0x2c   :  { %706 = vmatpush.msra.mxu3 %v486_v15 }
  0x2d   :  { %660 = vmatmul.msk.f32.gmra.mxu0 %vm65_vm0, %v32_v7  ;;  %v51_v7 = vld [vmem:[%s1140_s0 + $0xc0] sm:$0xff] }
  0x2e   :  { %707 = vmatpush.msra.mxu3 %v485_v17 }
  0x35   :  { %661 = vmatmul.msk.f32.gmra.mxu0 %vm65_vm0, %v33_v8 }
  0x3d   :  { %662 = vmatmul.msk.f32.gmra.mxu0 %vm65_vm0, %v34_v9 }
  0x45   :  { %663 = vmatmul.msk.f32.gmra.mxu0 %vm65_vm0, %v35_v10  ;;  %v56_v10 = vld [vmem:[%s1140_s0 + $0xe8] sm:$0xff] }
  0x46   :  { %684 = vmatmul.msk.f32.gmra.mxu3 %vm65_vm0, %v56_v10 }
  0x4d   :  { %664 = vmatmul.msk.f32.gmra.mxu0 %vm65_vm0, %v36_v14 }
  0x4e   :  { %685 = vmatmul.msk.f32.gmra.mxu3 %vm65_vm0, %v57_v18 }
  0x55   :  { %665 = vmatmul.msk.f32.gmra.mxu0 %vm65_vm0, %v37_v19  ;;  %v484_v19 = vld [vmem:[%s1145_s5 + $0x60] sm:$0xff] }
  0x56   :  { %495 = vmatpush.msra.mxu2 %v484_v19  ;;  %708 = vmatpush.msra.mxu3 %v484_v19 }
  0x57   :  { %686 = vmatmul.msk.f32.gmra.mxu3 %vm65_vm0, %v58_v26 }
  0x58   :  { %496 = vmatpush.msra.mxu2 %v483_v20  ;;  %709 = vmatpush.msra.mxu3 %v483_v20 }
  0x5a   :  { %497 = vmatpush.msra.mxu2 %v482_v23  ;;  %710 = vmatpush.msra.mxu3 %v482_v23 }
  0x5c   :  { %498 = vmatpush.msra.mxu2 %v481_v25  ;;  %711 = vmatpush.msra.mxu3 %v481_v25 }
  0x5d   :  { %666 = vmatmul.msk.f32.gmra.mxu0 %vm65_vm0, %v38_v24 }
  0x5e   :  { %499 = vmatpush.msra.mxu2 %v480_v27  ;;  %712 = vmatpush.msra.mxu3 %v480_v27 }
  0x65   :  { %667 = vmatmul.msk.f32.gmra.mxu0 %vm65_vm0, %v39_v28  ;;  %v479_v28 = vld [vmem:[%s1145_s5 + $0x38] sm:$0xff] }
  0x66   :  { %500 = vmatpush.msra.mxu2 %v479_v28  ;;  %713 = vmatpush.msra.mxu3 %v479_v28 }
  0x6d   :  { %668 = vmatmul.msk.f32.gmra.mxu0 %vm65_vm0, %v40_v31  ;;  %v478_v31 = vld [vmem:[%s1145_s5 + $0x30] sm:$0xff] }
  0x6e   :  { %501 = vmatpush.msra.mxu2 %v478_v31  ;;  %714 = vmatpush.msra.mxu3 %v478_v31 }
  0x75   :  { %669 = vmatmul.msk.f32.gmra.mxu0 %vm65_vm0, %v41_v32 }
  0x7d   :  { %670 = vmatmul.msk.f32.gmra.mxu0 %vm65_vm0, %v42_v33  ;;  %v477_v33 = vld [vmem:[%s1145_s5 + $0x28] sm:$0xff] }
  0x7e   :  { %502 = vmatpush.msra.mxu2 %v477_v33  ;;  %715 = vmatpush.msra.mxu3 %v477_v33 }
  0x82   :  { %v179_v35 = vpop.f32.mrf.mxu0 }
  0x83   :  { %v180_v37 = vadd.f32 %v917_v34, %v179_v35  ;;  %v476_v35 = vld [vmem:[%s1145_s5 + $0x20] sm:$0xff] }
  0x84   :  { %503 = vmatpush.msra.mxu2 %v476_v35  ;;  %716 = vmatpush.msra.mxu3 %v476_v35 }
  0x85   :  { %671 = vmatmul.msk.f32.gmra.mxu0 %vm65_vm0, %v43_v36  ;;  %v275_v38 = vmax.f32 %v180_v37, 0.0  ;;  %v475_v36 = vld [vmem:[%s1145_s5 + $0x18] sm:$0xff] }
  0x86   :  { %504 = vmatpush.msra.mxu2 %v475_v36  ;;  %717 = vmatpush.msra.mxu3 %v475_v36 }
  0x87   :  { %343 = vmatmul.f32.vlgmr.msra.gmra.mxu1 %v275_v38 }
  0x8a   :  { %v182_v39 = vpop.f32.mrf.mxu0 }
  0x8b   :  { %v183_v41 = vadd.f32 %v917_v34, %v182_v39  ;;  %v474_v39 = vld [vmem:[%s1145_s5 + $0x10] sm:$0xff] }
  0x8c   :  { %505 = vmatpush.msra.mxu2 %v474_v39  ;;  %718 = vmatpush.msra.mxu3 %v474_v39 }
  0x8d   :  { %672 = vmatmul.msk.f32.gmra.mxu0 %vm65_vm0, %v44_v40  ;;  %v276_v42 = vmax.f32 %v183_v41, 0.0  ;;  %v473_v41 = vld [vmem:[%s1145_s5 + $0x8] sm:$0xff] }
  0x8e   :  { %506 = vmatpush.msra.mxu2 %v473_v41  ;;  %719 = vmatpush.msra.mxu3 %v473_v41 }
  0x8f   :  { %346 = vmatmul.f32.gmra.mxu1 %v276_v42  ;;  %v472_v42 = vld [vmem:[%s1145_s5] sm:$0xff] }
  0x90   :  { %507 = vmatpush.msra.mxu2 %v472_v42  ;;  %720 = vmatpush.msra.mxu3 %v472_v42 }
  0x92   :  { %v185_v43 = vpop.f32.mrf.mxu0 }
  0x93   :  { %v186_v45 = vadd.f32 %v917_v34, %v185_v43 }
  0x95   :  { %v277_v46 = vmax.f32 %v186_v45, 0.0  ;;  %673 = vmatmul.msk.f32.gmra.mxu0 %vm65_vm0, %v45_v44 }
  0x96   :  { %v257_v39 = vpop.f32.mrf.mxu3 }
  0x97   :  { %349 = vmatmul.f32.gmra.mxu1 %v277_v46 }
  0x9a   :  { %v188_v47 = vpop.f32.mrf.mxu0 }
  0x9b   :  { %v189_v49 = vadd.f32 %v917_v34, %v188_v47 }
  0x9d   :  { %v278_v50 = vmax.f32 %v189_v49, 0.0  ;;  %674 = vmatmul.msk.f32.gmra.mxu0 %vm65_vm0, %v46_v48 }
  0x9f   :  { %352 = vmatmul.f32.gmra.mxu1 %v278_v50 }
  0xa2   :  { %v191_v51 = vpop.f32.mrf.mxu0 }
  0xa3   :  { %v192_v53 = vadd.f32 %v917_v34, %v191_v51 }
  0xa5   :  { %v279_v54 = vmax.f32 %v192_v53, 0.0  ;;  %675 = vmatmul.msk.f32.gmra.mxu0 %vm65_vm0, %v47_v52  ;;  %v1050_v52 = vld [vmem:[%s1144_s4] ss:$0 sm:$0xff] }
  0xa7   :  { %355 = vmatmul.f32.gmra.mxu1 %v279_v54 }
  0xaa   :  { %v194_v55 = vpop.f32.mrf.mxu0 }
  0xab   :  { %v195_v57 = vadd.f32 %v917_v34, %v194_v55 }
  0xad   :  { %v280_v58 = vmax.f32 %v195_v57, 0.0  ;;  %676 = vmatmul.msk.f32.gmra.mxu0 %vm65_vm0, %v48_v56 }
  0xaf   :  { %358 = vmatmul.f32.gmra.mxu1 %v280_v58 }
  0xb2   :  { %v197_v60 = vpop.f32.mrf.mxu0 }
  0xb3   :  { %v198_v62 = vadd.f32 %v917_v34, %v197_v60 }
  0xb5   :  { %v281_v63 = vmax.f32 %v198_v62, 0.0  ;;  %677 = vmatmul.msk.f32.gmra.mxu0 %vm65_vm0, %v49_v61 }
  0xb7   :  { %361 = vmatmul.f32.gmra.mxu1 %v281_v63 }
  0xba   :  { %v200_v1 = vpop.f32.mrf.mxu0 }
  0xbb   :  { %v201_v3 = vadd.f32 %v917_v34, %v200_v1 }
  0xbd   :  { %v282_v4 = vmax.f32 %v201_v3, 0.0  ;;  %678 = vmatmul.msk.f32.gmra.mxu0 %vm65_vm0, %v50_v2 }
  0xbf   :  { %364 = vmatmul.f32.gmra.mxu1 %v282_v4 }
  0xc2   :  { %v203_v6 = vpop.f32.mrf.mxu0 }
  0xc3   :  { %v204_v8 = vadd.f32 %v917_v34, %v203_v6 }
  0xc5   :  { %v283_v9 = vmax.f32 %v204_v8, 0.0  ;;  %679 = vmatmul.msk.f32.gmra.mxu0 %vm65_vm0, %v51_v7 }
  0xc7   :  { %367 = vmatmul.f32.gmra.mxu1 %v283_v9 }
  0xca   :  { %v206_v12 = vpop.f32.mrf.mxu0 }
  0xcb   :  { %v207_v14 = vadd.f32 %v917_v34, %v206_v12 }
  0xcd   :  { %v284_v16 = vmax.f32 %v207_v14, 0.0  ;;  %680 = vmatmul.msk.f32.gmra.mxu0 %vm65_vm0, %v52_v13 }
  0xcf   :  { %370 = vmatmul.f32.gmra.mxu1 %v284_v16 }
  0xd2   :  { %v209_v21 = vpop.f32.mrf.mxu0 }
  0xd3   :  { %v210_v22 = vadd.f32 %v917_v34, %v209_v21 }
  0xd5   :  { %v285_v24 = vmax.f32 %v210_v22, 0.0 }
  0xd7   :  { %373 = vmatmul.f32.gmra.mxu1 %v285_v24 }
  0xda   :  { %v212_v29 = vpop.f32.mrf.mxu0 }
  0xdb   :  { %v213_v30 = vadd.f32 %v917_v34, %v212_v29 }
  0xdd   :  { %v286_v32 = vmax.f32 %v213_v30, 0.0 }
  0xdf   :  { %376 = vmatmul.f32.gmra.mxu1 %v286_v32 }
  0xe2   :  { %v215_v37 = vpop.f32.mrf.mxu0 }
  0xe3   :  { %v216_v38 = vadd.f32 %v917_v34, %v215_v37 }
  0xe5   :  { %v287_v40 = vmax.f32 %v216_v38, 0.0 }
  0xe7   :  { %379 = vmatmul.f32.gmra.mxu1 %v287_v40 }
  0xea   :  { %v218_v43 = vpop.f32.mrf.mxu0 }
  0xeb   :  { %v219_v44 = vadd.f32 %v917_v34, %v218_v43 }
  0xed   :  { %v288_v45 = vmax.f32 %v219_v44, 0.0 }
  0xef   :  { %382 = vmatmul.f32.gmra.mxu1 %v288_v45 }
  0xf2   :  { %v221_v46 = vpop.f32.mrf.mxu0 }
  0xf3   :  { %v222_v47 = vadd.f32 %v917_v34, %v221_v46 }
  0xf5   :  { %v289_v48 = vmax.f32 %v222_v47, 0.0 }
  0xf7   :  { %385 = vmatmul.f32.gmra.mxu1 %v289_v48  ;;  %v260_v48 = vpop.f32.mrf.mxu3 }
  0xfa   :  { %v224_v49 = vpop.f32.mrf.mxu0 }
  0xfb   :  { %v225_v50 = vadd.f32 %v917_v34, %v224_v49 }
  0xfd   :  { %v290_v51 = vmax.f32 %v225_v50, 0.0 }
  0xff   :  { %388 = vmatmul.f32.gmra.mxu1 %v290_v51 }
 0x102   :  { %v227_v53 = vpop.f32.mrf.mxu0 }
 0x103   :  { %v228_v54 = vadd.f32 %v917_v34, %v227_v53  ;;  %v258_v53 = vadd.f32 %v917_v34, %v257_v39 }
 0x104   :  { %v344_v55 = vpop.f32.mrf.mxu1 }
 0x105   :  { %v291_v56 = vmax.f32 %v228_v54, 0.0  ;;  %v345_v57 = vadd.f32 %v1050_v52, %v344_v55  ;;  %v301_v54 = vmax.f32 %v258_v53, 0.0 }
 0x107   :  { %v440_v58 = vmax.f32 %v345_v57, 0.0  ;;  %391 = vmatmul.f32.gmra.mxu1 %v291_v56  ;;  %v263_v57 = vpop.f32.mrf.mxu3 }
 0x109   :  { %508 = vmatmul.f32.vlgmr.msra.gmra.mxu2 %v440_v58 }
 0x10a   :  { %v230_v59 = vpop.f32.mrf.mxu0 }
 0x10b   :  { %v231_v60 = vadd.f32 %v917_v34, %v230_v59  ;;  %v261_v59 = vadd.f32 %v917_v34, %v260_v48 }
 0x10c   :  { %v347_v61 = vpop.f32.mrf.mxu1 }
 0x10d   :  { %v292_v62 = vmax.f32 %v231_v60, 0.0  ;;  %v348_v63 = vadd.f32 %v1050_v52, %v347_v61  ;;  %v302_v60 = vmax.f32 %v261_v59, 0.0 }
 0x10f   :  { %v441_v0 = vmax.f32 %v348_v63, 0.0  ;;  %394 = vmatmul.f32.gmra.mxu1 %v292_v62 }
 0x111   :  { %511 = vmatmul.f32.gmra.mxu2 %v441_v0  ;;  %v264_v0 = vadd.f32 %v917_v34, %v263_v57 }
 0x112   :  { %v233_v1 = vpop.f32.mrf.mxu0 }
 0x113   :  { %v234_v2 = vadd.f32 %v917_v34, %v233_v1  ;;  %v266_v1 = vpop.f32.mrf.mxu3 }
 0x114   :  { %v350_v3 = vpop.f32.mrf.mxu1 }
 0x115   :  { %v293_v4 = vmax.f32 %v234_v2, 0.0  ;;  %v351_v5 = vadd.f32 %v1050_v52, %v350_v3  ;;  %v303_v2 = vmax.f32 %v264_v0, 0.0 }
 0x117   :  { %v442_v6 = vmax.f32 %v351_v5, 0.0  ;;  %397 = vmatmul.f32.gmra.mxu1 %v293_v4 }
 0x119   :  { %514 = vmatmul.f32.gmra.mxu2 %v442_v6  ;;  %v267_v6 = vadd.f32 %v917_v34, %v266_v1 }
 0x11a   :  { %v236_v7 = vpop.f32.mrf.mxu0 }
 0x11b   :  { %v237_v8 = vadd.f32 %v917_v34, %v236_v7  ;;  %v269_v7 = vpop.f32.mrf.mxu3 }
 0x11c   :  { %v353_v9 = vpop.f32.mrf.mxu1 }
 0x11d   :  { %v294_v10 = vmax.f32 %v237_v8, 0.0  ;;  %v354_v11 = vadd.f32 %v1050_v52, %v353_v9  ;;  %v304_v8 = vmax.f32 %v267_v6, 0.0 }
 0x11f   :  { %v443_v12 = vmax.f32 %v354_v11, 0.0  ;;  %400 = vmatmul.f32.gmra.mxu1 %v294_v10 }
 0x121   :  { %517 = vmatmul.f32.gmra.mxu2 %v443_v12  ;;  %v270_v12 = vadd.f32 %v917_v34, %v269_v7 }
 0x122   :  { %v239_v13 = vpop.f32.mrf.mxu0 }
 0x123   :  { %v240_v14 = vadd.f32 %v917_v34, %v239_v13  ;;  %v305_v13 = vmax.f32 %v270_v12, 0.0 }
 0x124   :  { %v356_v15 = vpop.f32.mrf.mxu1 }
 0x125   :  { %v295_v16 = vmax.f32 %v240_v14, 0.0  ;;  %v357_v17 = vadd.f32 %v1050_v52, %v356_v15  ;;  %v272_v15 = vpop.f32.mrf.mxu3 }
 0x127   :  { %v444_v18 = vmax.f32 %v357_v17, 0.0  ;;  %403 = vmatmul.f32.gmra.mxu1 %v295_v16 }
 0x129   :  { %520 = vmatmul.f32.gmra.mxu2 %v444_v18  ;;  %v273_v18 = vadd.f32 %v917_v34, %v272_v15 }
 0x12a   :  { %v242_v19 = vpop.f32.mrf.mxu0 }
 0x12b   :  { %v243_v20 = vadd.f32 %v917_v34, %v242_v19  ;;  %v306_v19 = vmax.f32 %v273_v18, 0.0 }
 0x12c   :  { %v359_v21 = vpop.f32.mrf.mxu1 }
 0x12d   :  { %v296_v22 = vmax.f32 %v243_v20, 0.0  ;;  %v360_v23 = vadd.f32 %v1050_v52, %v359_v21 }
 0x12f   :  { %v445_v24 = vmax.f32 %v360_v23, 0.0  ;;  %406 = vmatmul.f32.gmra.mxu1 %v296_v22 }
 0x131   :  { %523 = vmatmul.f32.gmra.mxu2 %v445_v24 }
 0x132   :  { %v245_v25 = vpop.f32.mrf.mxu0 }
 0x133   :  { %v246_v26 = vadd.f32 %v917_v34, %v245_v25 }
 0x134   :  { %v362_v27 = vpop.f32.mrf.mxu1 }
 0x135   :  { %v297_v28 = vmax.f32 %v246_v26, 0.0  ;;  %v363_v29 = vadd.f32 %v1050_v52, %v362_v27  ;;  %v1088_v26 = vld [vmem:[%s1146_s6] ss:$0 sm:$0xff]  ;;  %s753_s6 = smov [#allocation2]  }
 0x136   :  { %s641_s1 = sshll.u32 %s753_s6, 4  ;;  %s642_s1 = int_to_ptr.vmem [resolvable:$true] %s641_s1 }
 0x137   :  { %v446_v30 = vmax.f32 %v363_v29, 0.0  ;;  %409 = vmatmul.f32.gmra.mxu1 %v297_v28 }
 0x139   :  { %526 = vmatmul.f32.gmra.mxu2 %v446_v30 }
 0x13a   :  { %v248_v31 = vpop.f32.mrf.mxu0 }
 0x13b   :  { %v249_v32 = vadd.f32 %v917_v34, %v248_v31 }
 0x13c   :  { %v365_v33 = vpop.f32.mrf.mxu1 }
 0x13d   :  { %v298_v35 = vmax.f32 %v249_v32, 0.0  ;;  %v366_v36 = vadd.f32 %v1050_v52, %v365_v33 }
 0x13f   :  { %v447_v37 = vmax.f32 %v366_v36, 0.0  ;;  %412 = vmatmul.f32.gmra.mxu1 %v298_v35 }
 0x141   :  { %529 = vmatmul.f32.gmra.mxu2 %v447_v37 }
 0x142   :  { %v251_v38 = vpop.f32.mrf.mxu0 }
 0x143   :  { %v252_v40 = vadd.f32 %v917_v34, %v251_v38 }
 0x144   :  { %v368_v41 = vpop.f32.mrf.mxu1 }
 0x145   :  { %v299_v42 = vmax.f32 %v252_v40, 0.0  ;;  %v369_v43 = vadd.f32 %v1050_v52, %v368_v41 }
 0x147   :  { %v448_v44 = vmax.f32 %v369_v43, 0.0  ;;  %415 = vmatmul.f32.vlgmr.msrb.gmra.mxu3 %v299_v42 }
 0x149   :  { %532 = vmatmul.f32.gmra.mxu2 %v448_v44 }
 0x14a   :  { %v254_v45 = vpop.f32.mrf.mxu0 }
 0x14b   :  { %v255_v46 = vadd.f32 %v917_v34, %v254_v45 }
 0x14c   :  { %v371_v47 = vpop.f32.mrf.mxu1 }
 0x14d   :  { %v300_v49 = vmax.f32 %v255_v46, 0.0  ;;  %v372_v50 = vadd.f32 %v1050_v52, %v371_v47 }
 0x14f   :  { %v449_v51 = vmax.f32 %v372_v50, 0.0  ;;  %418 = vmatmul.f32.gmra.mxu3 %v300_v49 }
 0x151   :  { %535 = vmatmul.f32.gmra.mxu2 %v449_v51 }
 0x154   :  { %v374_v55 = vpop.f32.mrf.mxu1 }
 0x155   :  { %v375_v56 = vadd.f32 %v1050_v52, %v374_v55 }
 0x157   :  { %v450_v58 = vmax.f32 %v375_v56, 0.0  ;;  %421 = vmatmul.f32.gmra.mxu3 %v301_v54 }
 0x159   :  { %538 = vmatmul.f32.gmra.mxu2 %v450_v58 }
 0x15c   :  { %v377_v61 = vpop.f32.mrf.mxu1 }
 0x15d   :  { %v378_v62 = vadd.f32 %v1050_v52, %v377_v61 }
 0x15f   :  { %v451_v63 = vmax.f32 %v378_v62, 0.0  ;;  %424 = vmatmul.f32.gmra.mxu3 %v302_v60 }
 0x161   :  { %541 = vmatmul.f32.gmra.mxu2 %v451_v63 }
 0x164   :  { %v380_v3 = vpop.f32.mrf.mxu1 }
 0x165   :  { %v381_v4 = vadd.f32 %v1050_v52, %v380_v3 }
 0x167   :  { %v452_v5 = vmax.f32 %v381_v4, 0.0  ;;  %427 = vmatmul.f32.gmra.mxu3 %v303_v2 }
 0x169   :  { %544 = vmatmul.f32.gmra.mxu2 %v452_v5 }
 0x16c   :  { %v383_v9 = vpop.f32.mrf.mxu1 }
 0x16d   :  { %v384_v10 = vadd.f32 %v1050_v52, %v383_v9 }
 0x16f   :  { %v453_v11 = vmax.f32 %v384_v10, 0.0  ;;  %430 = vmatmul.f32.gmra.mxu3 %v304_v8 }
 0x171   :  { %547 = vmatmul.f32.gmra.mxu2 %v453_v11 }
 0x174   :  { %v386_v14 = vpop.f32.mrf.mxu1 }
 0x175   :  { %v387_v16 = vadd.f32 %v1050_v52, %v386_v14 }
 0x177   :  { %v454_v17 = vmax.f32 %v387_v16, 0.0  ;;  %433 = vmatmul.f32.gmra.mxu3 %v305_v13 }
 0x179   :  { %550 = vmatmul.f32.gmra.mxu2 %v454_v17 }
 0x17c   :  { %v389_v20 = vpop.f32.mrf.mxu1 }
 0x17d   :  { %v390_v21 = vadd.f32 %v1050_v52, %v389_v20 }
 0x17f   :  { %v455_v22 = vmax.f32 %v390_v21, 0.0  ;;  %436 = vmatmul.f32.gmra.mxu3 %v306_v19 }
 0x181   :  { %553 = vmatmul.f32.gmra.mxu2 %v455_v22 }
 0x184   :  { %v392_v23 = vpop.f32.mrf.mxu1 }
 0x185   :  { %v393_v24 = vadd.f32 %v1050_v52, %v392_v23 }
 0x187   :  { %v456_v25 = vmax.f32 %v393_v24, 0.0 }
 0x189   :  { %556 = vmatmul.f32.gmra.mxu2 %v456_v25 }
 0x18c   :  { %v395_v27 = vpop.f32.mrf.mxu1  ;;  %v509_v34 = vpop.f32.mrf.mxu2 }
 0x18d   :  { %v396_v28 = vadd.f32 %v1050_v52, %v395_v27  ;;  %v510_v29 = vadd.f32 %v1088_v26, %v509_v34 }
 0x18f   :  { %v457_v30 = vmax.f32 %v396_v28, 0.0  ;;  %605 = vst [vmem:[#allocation2] sm:$0xff] %v510_v29 }
 0x191   :  { %559 = vmatmul.f32.gmra.mxu2 %v457_v30 }
 0x194   :  { %v398_v31 = vpop.f32.mrf.mxu1  ;;  %v512_v32 = vpop.f32.mrf.mxu2 }
 0x195   :  { %v399_v33 = vadd.f32 %v1050_v52, %v398_v31  ;;  %v513_v35 = vadd.f32 %v1088_v26, %v512_v32 }
 0x197   :  { %v458_v36 = vmax.f32 %v399_v33, 0.0  ;;  %606 = vst [vmem:[#allocation2 + $0x8] sm:$0xff] %v513_v35 }
 0x199   :  { %562 = vmatmul.f32.gmra.mxu2 %v458_v36 }
 0x19c   :  { %v401_v37 = vpop.f32.mrf.mxu1  ;;  %v515_v38 = vpop.f32.mrf.mxu2 }
 0x19d   :  { %v402_v39 = vadd.f32 %v1050_v52, %v401_v37  ;;  %v516_v40 = vadd.f32 %v1088_v26, %v515_v38 }
 0x19f   :  { %v459_v41 = vmax.f32 %v402_v39, 0.0  ;;  %607 = vst [vmem:[#allocation2 + $0x10] sm:$0xff] %v516_v40 }
 0x1a1   :  { %565 = vmatmul.f32.gmra.mxu2 %v459_v41 }
 0x1a4   :  { %v404_v42 = vpop.f32.mrf.mxu1  ;;  %v518_v43 = vpop.f32.mrf.mxu2 }
 0x1a5   :  { %v405_v44 = vadd.f32 %v1050_v52, %v404_v42  ;;  %v519_v45 = vadd.f32 %v1088_v26, %v518_v43 }
 0x1a7   :  { %v460_v46 = vmax.f32 %v405_v44, 0.0  ;;  %608 = vst [vmem:[#allocation2 + $0x18] sm:$0xff] %v519_v45 }
 0x1a9   :  { %568 = vmatmul.f32.gmra.mxu2 %v460_v46 }
 0x1ac   :  { %v407_v47 = vpop.f32.mrf.mxu1  ;;  %v521_v48 = vpop.f32.mrf.mxu2 }
 0x1ad   :  { %v408_v49 = vadd.f32 %v1050_v52, %v407_v47  ;;  %v522_v50 = vadd.f32 %v1088_v26, %v521_v48 }
 0x1af   :  { %v461_v51 = vmax.f32 %v408_v49, 0.0  ;;  %609 = vst [vmem:[#allocation2 + $0x20] sm:$0xff] %v522_v50 }
 0x1b1   :  { %571 = vmatmul.f32.gmra.mxu2 %v461_v51 }
 0x1b4   :  { %v410_v53 = vpop.f32.mrf.mxu1  ;;  %v524_v54 = vpop.f32.mrf.mxu2 }
 0x1b5   :  { %v411_v55 = vadd.f32 %v1050_v52, %v410_v53  ;;  %v525_v56 = vadd.f32 %v1088_v26, %v524_v54 }
 0x1b7   :  { %v462_v57 = vmax.f32 %v411_v55, 0.0  ;;  %610 = vst [vmem:[#allocation2 + $0x28] sm:$0xff] %v525_v56 }
 0x1b9   :  { %574 = vmatmul.f32.gmra.mxu2 %v462_v57 }
 0x1bc   :  { %v413_v58 = vpop.f32.mrf.mxu1  ;;  %v527_v59 = vpop.f32.mrf.mxu2 }
 0x1bd   :  { %v414_v60 = vadd.f32 %v1050_v52, %v413_v58  ;;  %v528_v61 = vadd.f32 %v1088_v26, %v527_v59 }
 0x1bf   :  { %v463_v62 = vmax.f32 %v414_v60, 0.0  ;;  %611 = vst [vmem:[#allocation2 + $0x30] sm:$0xff] %v528_v61 }
 0x1c1   :  { %577 = vmatmul.f32.gmra.mxu2 %v463_v62 }
 0x1c4   :  { %v530_v63 = vpop.f32.mrf.mxu2 }
 0x1c5   :  { %v531_v0 = vadd.f32 %v1088_v26, %v530_v63 }
 0x1c7   :  { %612 = vst [vmem:[#allocation2 + $0x38] sm:$0xff] %v531_v0 }
 0x1ca   :  { %v416_v1 = vpop.f32.mrf.mxu3 }
 0x1cb   :  { %v417_v2 = vadd.f32 %v1050_v52, %v416_v1 }
 0x1cc   :  { %v533_v3 = vpop.f32.mrf.mxu2 }
 0x1cd   :  { %v464_v4 = vmax.f32 %v417_v2, 0.0  ;;  %v534_v5 = vadd.f32 %v1088_v26, %v533_v3 }
 0x1cf   :  { %613 = vst [vmem:[#allocation2 + $0x40] sm:$0xff] %v534_v5  ;;  %580 = vmatmul.f32.vlgmr.msra.gmra.mxu3 %v464_v4 }
 0x1d2   :  { %v419_v6 = vpop.f32.mrf.mxu3 }
 0x1d3   :  { %v420_v7 = vadd.f32 %v1050_v52, %v419_v6 }
 0x1d4   :  { %v536_v8 = vpop.f32.mrf.mxu2 }
 0x1d5   :  { %v465_v9 = vmax.f32 %v420_v7, 0.0  ;;  %v537_v10 = vadd.f32 %v1088_v26, %v536_v8 }
 0x1d7   :  { %614 = vst [vmem:[#allocation2 + $0x48] sm:$0xff] %v537_v10  ;;  %583 = vmatmul.f32.gmra.mxu3 %v465_v9 }
 0x1da   :  { %v422_v11 = vpop.f32.mrf.mxu3 }
 0x1db   :  { %v423_v12 = vadd.f32 %v1050_v52, %v422_v11 }
 0x1dc   :  { %v539_v13 = vpop.f32.mrf.mxu2 }
 0x1dd   :  { %v466_v14 = vmax.f32 %v423_v12, 0.0  ;;  %v540_v15 = vadd.f32 %v1088_v26, %v539_v13 }
 0x1df   :  { %615 = vst [vmem:[#allocation2 + $0x50] sm:$0xff] %v540_v15  ;;  %586 = vmatmul.f32.gmra.mxu3 %v466_v14 }
 0x1e2   :  { %v425_v16 = vpop.f32.mrf.mxu3 }
 0x1e3   :  { %v426_v17 = vadd.f32 %v1050_v52, %v425_v16 }
 0x1e4   :  { %v542_v18 = vpop.f32.mrf.mxu2 }
 0x1e5   :  { %v467_v19 = vmax.f32 %v426_v17, 0.0  ;;  %v543_v20 = vadd.f32 %v1088_v26, %v542_v18 }
 0x1e7   :  { %616 = vst [vmem:[#allocation2 + $0x58] sm:$0xff] %v543_v20  ;;  %589 = vmatmul.f32.gmra.mxu3 %v467_v19 }
 0x1ea   :  { %v428_v21 = vpop.f32.mrf.mxu3 }
 0x1eb   :  { %v429_v22 = vadd.f32 %v1050_v52, %v428_v21 }
 0x1ec   :  { %v545_v23 = vpop.f32.mrf.mxu2 }
 0x1ed   :  { %v468_v24 = vmax.f32 %v429_v22, 0.0  ;;  %v546_v25 = vadd.f32 %v1088_v26, %v545_v23 }
 0x1ef   :  { %617 = vst [vmem:[#allocation2 + $0x60] sm:$0xff] %v546_v25  ;;  %592 = vmatmul.f32.gmra.mxu3 %v468_v24 }
 0x1f2   :  { %v431_v27 = vpop.f32.mrf.mxu3 }
 0x1f3   :  { %v432_v34 = vadd.f32 %v1050_v52, %v431_v27 }
 0x1f4   :  { %v548_v28 = vpop.f32.mrf.mxu2 }
 0x1f5   :  { %v469_v29 = vmax.f32 %v432_v34, 0.0  ;;  %v549_v30 = vadd.f32 %v1088_v26, %v548_v28 }
 0x1f7   :  { %618 = vst [vmem:[#allocation2 + $0x68] sm:$0xff] %v549_v30  ;;  %595 = vmatmul.f32.gmra.mxu3 %v469_v29 }
 0x1fa   :  { %v434_v31 = vpop.f32.mrf.mxu3 }
 0x1fb   :  { %v435_v32 = vadd.f32 %v1050_v52, %v434_v31 }
 0x1fc   :  { %v551_v33 = vpop.f32.mrf.mxu2 }
 0x1fd   :  { %v470_v35 = vmax.f32 %v435_v32, 0.0  ;;  %v552_v36 = vadd.f32 %v1088_v26, %v551_v33 }
 0x1ff   :  { %619 = vst [vmem:[#allocation2 + $0x70] sm:$0xff] %v552_v36  ;;  %598 = vmatmul.f32.gmra.mxu3 %v470_v35 }
 0x202   :  { %v437_v37 = vpop.f32.mrf.mxu3 }
 0x203   :  { %v438_v38 = vadd.f32 %v1050_v52, %v437_v37 }
 0x204   :  { %v554_v39 = vpop.f32.mrf.mxu2 }
 0x205   :  { %v471_v40 = vmax.f32 %v438_v38, 0.0  ;;  %v555_v41 = vadd.f32 %v1088_v26, %v554_v39 }
 0x207   :  { %620 = vst [vmem:[#allocation2 + $0x78] sm:$0xff] %v555_v41  ;;  %601 = vmatmul.f32.gmra.mxu3 %v471_v40 }
 0x20c   :  { %v557_v42 = vpop.f32.mrf.mxu2 }
 0x20d   :  { %v558_v43 = vadd.f32 %v1088_v26, %v557_v42 }
 0x20f   :  { %621 = vst [vmem:[#allocation2 + $0x80] sm:$0xff] %v558_v43 }
 0x214   :  { %v560_v44 = vpop.f32.mrf.mxu2 }
 0x215   :  { %v561_v45 = vadd.f32 %v1088_v26, %v560_v44 }
 0x217   :  { %622 = vst [vmem:[#allocation2 + $0x88] sm:$0xff] %v561_v45 }
 0x21c   :  { %v563_v46 = vpop.f32.mrf.mxu2 }
 0x21d   :  { %v564_v47 = vadd.f32 %v1088_v26, %v563_v46 }
 0x21f   :  { %623 = vst [vmem:[#allocation2 + $0x90] sm:$0xff] %v564_v47 }
 0x224   :  { %v566_v48 = vpop.f32.mrf.mxu2 }
 0x225   :  { %v567_v52 = vadd.f32 %v1088_v26, %v566_v48 }
 0x227   :  { %624 = vst [vmem:[#allocation2 + $0x98] sm:$0xff] %v567_v52 }
 0x22c   :  { %v569_v49 = vpop.f32.mrf.mxu2 }
 0x22d   :  { %v570_v50 = vadd.f32 %v1088_v26, %v569_v49 }
 0x22f   :  { %625 = vst [vmem:[#allocation2 + $0xa0] sm:$0xff] %v570_v50 }
 0x234   :  { %v572_v51 = vpop.f32.mrf.mxu2 }
 0x235   :  { %v573_v53 = vadd.f32 %v1088_v26, %v572_v51 }
 0x237   :  { %626 = vst [vmem:[#allocation2 + $0xa8] sm:$0xff] %v573_v53 }
 0x23c   :  { %v575_v54 = vpop.f32.mrf.mxu2 }
 0x23d   :  { %v576_v55 = vadd.f32 %v1088_v26, %v575_v54 }
 0x23f   :  { %627 = vst [vmem:[#allocation2 + $0xb0] sm:$0xff] %v576_v55 }
 0x244   :  { %v578_v56 = vpop.f32.mrf.mxu2 }
 0x245   :  { %v579_v57 = vadd.f32 %v1088_v26, %v578_v56 }
 0x247   :  { %628 = vst [vmem:[#allocation2 + $0xb8] sm:$0xff] %v579_v57 }
 0x252   :  { %v581_v58 = vpop.f32.mrf.mxu3 }
 0x253   :  { %v582_v59 = vadd.f32 %v1088_v26, %v581_v58 }
 0x255   :  { %629 = vst [vmem:[#allocation2 + $0xc0] sm:$0xff] %v582_v59 }
 0x25a   :  { %v584_v60 = vpop.f32.mrf.mxu3 }
 0x25b   :  { %v585_v61 = vadd.f32 %v1088_v26, %v584_v60 }
 0x25d   :  { %630 = vst [vmem:[#allocation2 + $0xc8] sm:$0xff] %v585_v61 }
 0x262   :  { %v587_v62 = vpop.f32.mrf.mxu3 }
 0x263   :  { %v588_v63 = vadd.f32 %v1088_v26, %v587_v62 }
 0x265   :  { %631 = vst [vmem:[#allocation2 + $0xd0] sm:$0xff] %v588_v63 }
 0x26a   :  { %v590_v0 = vpop.f32.mrf.mxu3 }
 0x26b   :  { %v591_v1 = vadd.f32 %v1088_v26, %v590_v0 }
 0x26d   :  { %632 = vst [vmem:[#allocation2 + $0xd8] sm:$0xff] %v591_v1 }
 0x272   :  { %v593_v2 = vpop.f32.mrf.mxu3 }
 0x273   :  { %v594_v3 = vadd.f32 %v1088_v26, %v593_v2 }
 0x275   :  { %633 = vst [vmem:[#allocation2 + $0xe0] sm:$0xff] %v594_v3 }
 0x27a   :  { %v596_v4 = vpop.f32.mrf.mxu3 }
 0x27b   :  { %v597_v5 = vadd.f32 %v1088_v26, %v596_v4 }
 0x27d   :  { %634 = vst [vmem:[#allocation2 + $0xe8] sm:$0xff] %v597_v5 }
 0x282   :  { %v599_v6 = vpop.f32.mrf.mxu3 }
 0x283   :  { %v600_v7 = vadd.f32 %v1088_v26, %v599_v6 }
 0x285   :  { %635 = vst [vmem:[#allocation2 + $0xf0] sm:$0xff] %v600_v7 }
 0x28a   :  { %v602_v8 = vpop.f32.mrf.mxu3 }
 0x28b   :  { %v603_v9 = vadd.f32 %v1088_v26, %v602_v8 }
 0x28d   :  { %636 = vst [vmem:[#allocation2 + $0xf8] sm:$0xff] %v603_v9 }
 0x28e   :  { %649 = dma.vmem_to_hbm [thread:$0]  %s642_s1, 4096, %s644_s12, [#allocation3], %s754_s13, %s754_s13, %s755_s14  }
 0x28f   :  { %751 = dma.done.wait [#allocation3], 4096  }
 0x290   :  { %752 = vsyncadd [#allocation3], 4294963200 }
 0x291   :  { %654 = vsyncpa [#allocation3], 1 }

</bundles_post_ra>
